<compile_context>
chip_gen: v5e
topology: v5e:2x2
jax: 0.10.0
libtpu: 0.0.40
codegen_flags: <defaults>
</compile_context>

<pallas_src>
import functools
import math

import jax
import jax.numpy as jnp
from jax.experimental import pallas as pl
from jax.experimental.pallas import tpu as pltpu


# ----------------------------------------------------------------------------
# Fused Pallas kernel: whole LSTM+GRU recurrence for one batch tile.
# ----------------------------------------------------------------------------

def _fused_lstm_gru_kernel(x_ref, wx_ref, wh_ref, b_ref, out_ref, xp_ref, *, T, H):
    """x_ref  : (T, TB, I)  time-major input block (whole sequence VMEM resident).
       wx_ref : (I, 8H)     packed x-side weights, gate cols [i,f,o,r | z,g,gi_n,gh_n].
       wh_ref : (2H, 8H)    packed recurrent weights, rows [h_lstm | h_gru].
       b_ref  : (1, 8H)     packed biases (folded once into the hoisted x-projection).
       out_ref: (TB, 2H)    doubles as the contiguous hidden-state buffer [h_lstm | h_gru].
       xp_ref : (T*TB, 8H)  VMEM scratch holding the hoisted x-projection.
    """
    TB = out_ref.shape[0]
    I = x_ref.shape[2]

    wx = wx_ref[...]
    wh = wh_ref[...]

    # ---- hoisted x-projection: ONE (T*TB, I) @ (I, 8H) matmul + bias, outside the loop ----
    # Time-major leading-dim merge; TB % 8 == 0 so the reshape is layout-free.
    x_tm = x_ref[...].reshape(T * TB, I)
    xp_ref[...] = (jnp.dot(x_tm.astype(wx.dtype), wx,
                           preferred_element_type=jnp.float32) + b_ref[...])

    # Hidden state [h_lstm | h_gru] lives directly in the lane-dense output block.
    out_ref[...] = jnp.zeros_like(out_ref)

    def cell(xp_t, c):
        h = out_ref[...]                                                  # (TB, 2H)
        gates = xp_t + jnp.dot(h.astype(wh.dtype), wh,
                               preferred_element_type=jnp.float32)        # (TB, 8H)
        # [i, f, o, r] occupy lanes 0:4H — exactly one 128-lane vreg for H=32.
        sig = jax.nn.sigmoid(gates[:, 0:4 * H])
        i_g = sig[:, 0 * H:1 * H]
        f_g = sig[:, 1 * H:2 * H]
        o_g = sig[:, 2 * H:3 * H]
        r_g = sig[:, 3 * H:4 * H]
        z_g = jax.nn.sigmoid(gates[:, 4 * H:5 * H])
        g_c = jnp.tanh(gates[:, 5 * H:6 * H])                             # LSTM cell input
        n_g = jnp.tanh(gates[:, 6 * H:7 * H] + r_g * gates[:, 7 * H:8 * H])  # GRU candidate
        c_new = f_g * c + i_g * g_c
        out_ref[:, 0:H] = o_g * jnp.tanh(c_new)                           # LSTM hidden
        out_ref[:, H:2 * H] = (1.0 - z_g) * n_g + z_g * h[:, H:2 * H]     # GRU hidden
        return c_new

    c0 = jnp.zeros((TB, H), jnp.float32)
    if T <= 16:
        # Short sequences: full unroll (static tile-aligned slices, max LLO visibility).
        c = c0
        for t in range(T):
            c = cell(xp_ref[t * TB:(t + 1) * TB, :], c)
    else:
        # Long sequences: bounded code size / vreg pressure.
        def body(t, c):
            row = pl.multiple_of(t * TB, 8)
            return cell(xp_ref[pl.ds(row, TB), :], c)
        c = jax.lax.fori_loop(0, T, body, c0, unroll=2)
    # Final [LSTM | GRU] hidden state already sits in out_ref — nothing more to store.


# ----------------------------------------------------------------------------
# One-time parameter packing (outside the forward path).
# ----------------------------------------------------------------------------

def pack_parallel_rec_params(params, input_size, hidden_size, dtype=jnp.float32):
    """Builds packed W_x (I, 8H), W_h (2H, 8H) and bias (1, 8H) from PyTorch-layout params.

    PyTorch gate orders: LSTM w_ih/w_hh row blocks = [i, f, g, o];
                         GRU  w_ih/w_hh row blocks = [r, z, n].
    Packed gate column order: [i, f, o, r, z, g, gi_n, gh_n]  (sigmoid group = lanes 0:4H).
    """
    I, H = input_size, hidden_size
    WihL, WhhL = params['lstm']['w_ih'], params['lstm']['w_hh']          # (4H,I), (4H,H)
    bL = params['lstm']['b_ih'] + params['lstm']['b_hh']                 # (4H,)
    WihG, WhhG = params['gru']['w_ih'], params['gru']['w_hh']            # (3H,I), (3H,H)
    bihG, bhhG = params['gru']['b_ih'], params['gru']['b_hh']            # (3H,)

    def wblk(W, k):  # gate block k, transposed to (in_dim, H)
        return jnp.transpose(W[k * H:(k + 1) * H])

    def bblk(bvec, k):
        return bvec[k * H:(k + 1) * H]

    zIH = jnp.zeros((I, H), jnp.float32)
    zHH = jnp.zeros((H, H), jnp.float32)

    # x-side weights (rows = x_t)
    w_x = jnp.concatenate([
        wblk(WihL, 0), wblk(WihL, 1), wblk(WihL, 3),     # i, f, o
        wblk(WihG, 0), wblk(WihG, 1),                    # r, z
        wblk(WihL, 2),                                   # g
        wblk(WihG, 2),                                   # gi_n
        zIH,                                             # gh_n (no x term)
    ], axis=1)                                           # (I, 8H)

    # recurrent weights, rows 0:H = h_lstm contribution
    wh_l = jnp.concatenate([
        wblk(WhhL, 0), wblk(WhhL, 1), wblk(WhhL, 3),     # i, f, o
        zHH, zHH,                                        # r, z
        wblk(WhhL, 2),                                   # g
        zHH, zHH,                                        # gi_n, gh_n
    ], axis=1)                                           # (H, 8H)

    # recurrent weights, rows H:2H = h_gru contribution
    wh_g = jnp.concatenate([
        zHH, zHH, zHH,                                   # i, f, o
        wblk(WhhG, 0), wblk(WhhG, 1),                    # r, z
        zHH, zHH,                                        # g, gi_n
        wblk(WhhG, 2),                                   # gh_n
    ], axis=1)                                           # (H, 8H)

    w_h = jnp.concatenate([wh_l, wh_g], axis=0)          # (2H, 8H)

    b_packed = jnp.concatenate([
        bblk(bL, 0), bblk(bL, 1), bblk(bL, 3),                           # i, f, o
        bblk(bihG, 0) + bblk(bhhG, 0), bblk(bihG, 1) + bblk(bhhG, 1),    # r, z
        bblk(bL, 2),                                                     # g
        bblk(bihG, 2),                                                   # gi_n (input bias)
        bblk(bhhG, 2),                                                   # gh_n (hidden bias)
    ]).reshape(1, 8 * H).astype(jnp.float32)

    return w_x.astype(dtype), w_h.astype(dtype), b_packed


# ----------------------------------------------------------------------------
# Forward wrapper (single pallas_call; grid tiled over batch, "parallel" for v7x megacore).
# ----------------------------------------------------------------------------

def parallel_rec_models_forward(x, w_x, w_h, b_packed, hidden_size, *, batch_tile=None):
    """ParallelRecModels.forward: concat([LSTM last hidden, GRU last hidden], -1)."""
    B, T, I = x.shape
    H = hidden_size

    # Pad batch to a multiple of 8 (f32 sublane tile) so every vreg / MXU M-row is aligned.
    B_pad = max(8, -(-B // 8) * 8)
    TB = batch_tile if batch_tile is not None else min(B_pad, 256)
    TB = max(8, -(-TB // 8) * 8)
    B_pad = -(-B_pad // TB) * TB
    if B_pad != B:
        x = jnp.pad(x, ((0, B_pad - B), (0, 0), (0, 0)))

    # One tiny time-major relayout so the in-kernel x-projection is a single matmul and each
    # step's xp slice is a contiguous, tile-aligned row block (no per-step sublane gathers).
    x_tm = jnp.transpose(x, (1, 0, 2))                    # (T, B_pad, I)

    grid = (B_pad // TB,)

    # Explicit VMEM budget (review: re-budget against v7x's 64 MiB / 32 MiB scoped default).
    tile_bytes = 4 * (2 * T * TB * I                       # x block (double-buffered)
                      + I * 8 * H + 2 * H * 8 * H + 8 * H  # resident packed weights / bias
                      + 2 * TB * 2 * H                     # output block (double-buffered)
                      + T * TB * 8 * H)                    # xp scratch
    vmem_limit = int(min(100 * (1 << 20), max(16 * (1 << 20), 4 * tile_bytes)))

    out = pl.pallas_call(
        functools.partial(_fused_lstm_gru_kernel, T=T, H=H),
        out_shape=jax.ShapeDtypeStruct((B_pad, 2 * H), jnp.float32),
        grid=grid,
        in_specs=[
            pl.BlockSpec((T, TB, I), lambda i: (0, i, 0)),        # batch tile of the sequence
            pl.BlockSpec((I, 8 * H), lambda i: (0, 0)),           # packed W_x (VMEM resident)
            pl.BlockSpec((2 * H, 8 * H), lambda i: (0, 0)),       # packed W_h (VMEM resident)
            pl.BlockSpec((1, 8 * H), lambda i: (0, 0)),           # packed bias
        ],
        out_specs=pl.BlockSpec((TB, 2 * H), lambda i: (i, 0)),
        scratch_shapes=[pltpu.VMEM((T * TB, 8 * H), jnp.float32)],
        compiler_params=pltpu.CompilerParams(
            dimension_semantics=("parallel",),                    # v7x: batch tiles across TCs
            vmem_limit_bytes=vmem_limit,
        ),
    )(x_tm, w_x, w_h, b_packed)

    return out[:B]


# ----------------------------------------------------------------------------
# Pure-JAX reference (lax.scan) for correctness checking
# ----------------------------------------------------------------------------

def _lstm_ref(x, w_ih, w_hh, b_ih, b_hh):
    B, T, I = x.shape
    H = w_hh.shape[1]

    def step(carry, x_t):
        h, c = carry
        gates = x_t @ w_ih.T + b_ih + h @ w_hh.T + b_hh
        i = jax.nn.sigmoid(gates[:, 0 * H:1 * H])
        f = jax.nn.sigmoid(gates[:, 1 * H:2 * H])
        g = jnp.tanh(gates[:, 2 * H:3 * H])
        o = jax.nn.sigmoid(gates[:, 3 * H:4 * H])
        c = f * c + i * g
        h = o * jnp.tanh(c)
        return (h, c), None

    h0 = jnp.zeros((B, H), jnp.float32)
    (h, _), _ = jax.lax.scan(step, (h0, h0), jnp.transpose(x, (1, 0, 2)))
    return h


def _gru_ref(x, w_ih, w_hh, b_ih, b_hh):
    B, T, I = x.shape
    H = w_hh.shape[1]

    def step(h, x_t):
        gi = x_t @ w_ih.T + b_ih
        gh = h @ w_hh.T + b_hh
        r = jax.nn.sigmoid(gi[:, 0 * H:1 * H] + gh[:, 0 * H:1 * H])
        z = jax.nn.sigmoid(gi[:, 1 * H:2 * H] + gh[:, 1 * H:2 * H])
        n = jnp.tanh(gi[:, 2 * H:3 * H] + r * gh[:, 2 * H:3 * H])
        h = (1.0 - z) * n + z * h
        return h, None

    h0 = jnp.zeros((B, H), jnp.float32)
    h, _ = jax.lax.scan(step, h0, jnp.transpose(x, (1, 0, 2)))
    return h


def _reference(x, params):
    lstm_out = _lstm_ref(x, params['lstm']['w_ih'], params['lstm']['w_hh'],
                         params['lstm']['b_ih'], params['lstm']['b_hh'])
    gru_out = _gru_ref(x, params['gru']['w_ih'], params['gru']['w_hh'],
                       params['gru']['b_ih'], params['gru']['b_hh'])
    return jnp.concatenate([lstm_out, gru_out], axis=-1)


# ----------------------------------------------------------------------------
# Main
# ----------------------------------------------------------------------------

if __name__ == "__main__":
    B, T, I = 2, 8, 16
    H = 32

    key = jax.random.PRNGKey(0)
    kx, k1, k2, k3, k4, k5, k6, k7, k8 = jax.random.split(key, 9)

    def uinit(k, shape, hidden):
        bound = 1.0 / math.sqrt(hidden)
        return jax.random.uniform(k, shape, jnp.float32, -bound, bound)

    params = {
        'lstm': {
            'w_ih': uinit(k1, (4 * H, I), H),
            'w_hh': uinit(k2, (4 * H, H), H),
            'b_ih': uinit(k3, (4 * H,), H),
            'b_hh': uinit(k4, (4 * H,), H),
        },
        'gru': {
            'w_ih': uinit(k5, (3 * H, I), H),
            'w_hh': uinit(k6, (3 * H, H), H),
            'b_ih': uinit(k7, (3 * H,), H),
            'b_hh': uinit(k8, (3 * H,), H),
        },
    }

    x = jax.random.normal(kx, (B, T, I), jnp.float32)

    # Pack weights ONCE (outside the forward path).  Use dtype=jnp.bfloat16 on v6e/v7x to
    # halve weight DMA/VMEM (loosen the tolerance below accordingly).
    w_x, w_h, b_packed = pack_parallel_rec_params(params, I, H, dtype=jnp.float32)
    w_x, w_h, b_packed = jax.block_until_ready((w_x, w_h, b_packed))

    out = parallel_rec_models_forward(x, w_x, w_h, b_packed, H)
    out = jax.block_until_ready(out)
    assert out.shape == (B, 2 * H), out.shape

    ref = jax.block_until_ready(_reference(x, params))
    assert jnp.allclose(out, ref, atol=1e-4, rtol=1e-4), (
        f"mismatch: max abs err {jnp.max(jnp.abs(out - ref))}")

    print("KERNEL_OK")
</pallas_src>

<mosaic_0001>
module attributes {stable_mosaic.version = 11 : i64} {
  func.func @_fused_lstm_gru_kernel(%arg0: i32, %arg1: memref<8x8x16xf32, #tpu.memory_space<vmem>>, %arg2: memref<16x256xf32, #tpu.memory_space<vmem>>, %arg3: memref<64x256xf32, #tpu.memory_space<vmem>>, %arg4: memref<1x256xf32, #tpu.memory_space<vmem>>, %arg5: memref<8x64xf32, #tpu.memory_space<vmem>>, %arg6: memref<64x256xf32, #tpu.memory_space<vmem>>) attributes {dimension_semantics = [#tpu.dimension_semantics<parallel>], iteration_bounds = array<i64: 1>, scalar_prefetch = 0 : i64, scratch_operands = 1 : i64, tpu.core_type = #tpu.core_type<tc>, window_params = [{transform_indices = @transform_0, window_bounds = array<i64: 8, 8, 16>}, {pipeline_mode = #tpu.pipeline_mode<synchronous>, transform_indices = @transform_1, window_bounds = array<i64: 16, 256>}, {pipeline_mode = #tpu.pipeline_mode<synchronous>, transform_indices = @transform_2, window_bounds = array<i64: 64, 256>}, {pipeline_mode = #tpu.pipeline_mode<synchronous>, transform_indices = @transform_3, window_bounds = array<i64: 1, 256>}, {transform_indices = @transform_4, window_bounds = array<i64: 8, 64>}]} {
    %c0 = arith.constant 0 : index
    %c0_0 = arith.constant 0 : index
    %0 = vector.load %arg2[%c0, %c0_0] : memref<16x256xf32, #tpu.memory_space<vmem>>, vector<16x256xf32>
    %c0_1 = arith.constant 0 : index
    %c0_2 = arith.constant 0 : index
    %1 = vector.load %arg3[%c0_1, %c0_2] : memref<64x256xf32, #tpu.memory_space<vmem>>, vector<64x256xf32>
    %c0_3 = arith.constant 0 : index
    %c0_4 = arith.constant 0 : index
    %c0_5 = arith.constant 0 : index
    %2 = vector.load %arg1[%c0_3, %c0_4, %c0_5] : memref<8x8x16xf32, #tpu.memory_space<vmem>>, vector<8x8x16xf32>
    %3 = vector.shape_cast %2 : vector<8x8x16xf32> to vector<64x16xf32>
    %cst = arith.constant dense<0.000000e+00> : vector<64x256xf32>
    %4 = tpu.matmul %3, %0, %cst {dimension_numbers = #tpu.dot_dimension_numbers<[1], [0], [0], [1], [0, 0, 1, 1], [], []>} : vector<64x16xf32>, vector<16x256xf32>, vector<64x256xf32> -> vector<64x256xf32>
    %c0_6 = arith.constant 0 : index
    %c0_7 = arith.constant 0 : index
    %5 = vector.load %arg4[%c0_6, %c0_7] : memref<1x256xf32, #tpu.memory_space<vmem>>, vector<1x256xf32>
    %6 = vector.broadcast %5 : vector<1x256xf32> to vector<64x256xf32>
    %7 = arith.addf %4, %6 : vector<64x256xf32>
    %c0_8 = arith.constant 0 : index
    %c0_9 = arith.constant 0 : index
    %8 = vector.load %arg6[%c0_8, %c0_9] : memref<64x256xf32, #tpu.memory_space<vmem>>, vector<64x256xf32>
    tpu.vector_store %arg6[%c0_8, %c0_9], %7 {strides = array<i32>} : memref<64x256xf32, #tpu.memory_space<vmem>>, vector<64x256xf32>,
    %cst_10 = arith.constant 0.000000e+00 : f32
    %9 = vector.broadcast %cst_10 : f32 to vector<8x64xf32>
    %c0_11 = arith.constant 0 : index
    %c0_12 = arith.constant 0 : index
    %10 = vector.load %arg5[%c0_11, %c0_12] : memref<8x64xf32, #tpu.memory_space<vmem>>, vector<8x64xf32>
    tpu.vector_store %arg5[%c0_11, %c0_12], %9 {strides = array<i32>} : memref<8x64xf32, #tpu.memory_space<vmem>>, vector<8x64xf32>,
    %cst_13 = arith.constant 0.000000e+00 : f32
    %11 = vector.broadcast %cst_13 : f32 to vector<8x32xf32>
    %c0_14 = arith.constant 0 : index
    %c0_15 = arith.constant 0 : index
    %12 = vector.load %arg6[%c0_14, %c0_15] : memref<64x256xf32, #tpu.memory_space<vmem>>, vector<8x256xf32>
    %c0_16 = arith.constant 0 : index
    %c0_17 = arith.constant 0 : index
    %13 = vector.load %arg5[%c0_16, %c0_17] : memref<8x64xf32, #tpu.memory_space<vmem>>, vector<8x64xf32>
    %cst_18 = arith.constant dense<0.000000e+00> : vector<8x256xf32>
    %14 = tpu.matmul %13, %1, %cst_18 {dimension_numbers = #tpu.dot_dimension_numbers<[1], [0], [0], [1], [0, 0, 1, 1], [], []>} : vector<8x64xf32>, vector<64x256xf32>, vector<8x256xf32> -> vector<8x256xf32>
    %15 = arith.addf %12, %14 : vector<8x256xf32>
    %16 = vector.extract_strided_slice %15 {offsets = [0, 0], sizes = [8, 128], strides = [1, 1]} : vector<8x256xf32> to vector<8x128xf32>
    %17 = arith.negf %16 : vector<8x128xf32>
    %18 = math.exp %17 : vector<8x128xf32>
    %cst_19 = arith.constant 1.000000e+00 : f32
    %19 = vector.broadcast %cst_19 : f32 to vector<8x128xf32>
    %20 = arith.addf %19, %18 : vector<8x128xf32>
    %21 = arith.divf %19, %20 : vector<8x128xf32>
    %22 = vector.extract_strided_slice %21 {offsets = [0, 0], sizes = [8, 32], strides = [1, 1]} : vector<8x128xf32> to vector<8x32xf32>
    %23 = vector.extract_strided_slice %21 {offsets = [0, 32], sizes = [8, 32], strides = [1, 1]} : vector<8x128xf32> to vector<8x32xf32>
    %24 = vector.extract_strided_slice %21 {offsets = [0, 64], sizes = [8, 32], strides = [1, 1]} : vector<8x128xf32> to vector<8x32xf32>
    %25 = vector.extract_strided_slice %21 {offsets = [0, 96], sizes = [8, 32], strides = [1, 1]} : vector<8x128xf32> to vector<8x32xf32>
    %26 = vector.extract_strided_slice %15 {offsets = [0, 128], sizes = [8, 32], strides = [1, 1]} : vector<8x256xf32> to vector<8x32xf32>
    %27 = arith.negf %26 : vector<8x32xf32>
    %28 = math.exp %27 : vector<8x32xf32>
    %cst_20 = arith.constant 1.000000e+00 : f32
    %29 = vector.broadcast %cst_20 : f32 to vector<8x32xf32>
    %30 = arith.addf %29, %28 : vector<8x32xf32>
    %31 = arith.divf %29, %30 : vector<8x32xf32>
    %32 = vector.extract_strided_slice %15 {offsets = [0, 160], sizes = [8, 32], strides = [1, 1]} : vector<8x256xf32> to vector<8x32xf32>
    %33 = math.tanh %32 : vector<8x32xf32>
    %34 = vector.extract_strided_slice %15 {offsets = [0, 192], sizes = [8, 32], strides = [1, 1]} : vector<8x256xf32> to vector<8x32xf32>
    %35 = vector.extract_strided_slice %15 {offsets = [0, 224], sizes = [8, 32], strides = [1, 1]} : vector<8x256xf32> to vector<8x32xf32>
    %36 = arith.mulf %25, %35 : vector<8x32xf32>
    %37 = arith.addf %34, %36 : vector<8x32xf32>
    %38 = math.tanh %37 : vector<8x32xf32>
    %39 = arith.mulf %23, %11 : vector<8x32xf32>
    %40 = arith.mulf %22, %33 : vector<8x32xf32>
    %41 = arith.addf %39, %40 : vector<8x32xf32>
    %42 = math.tanh %41 : vector<8x32xf32>
    %43 = arith.mulf %24, %42 : vector<8x32xf32>
    %c0_21 = arith.constant 0 : index
    %c0_22 = arith.constant 0 : index
    %44 = vector.load %arg5[%c0_21, %c0_22] : memref<8x64xf32, #tpu.memory_space<vmem>>, vector<8x32xf32>
    tpu.vector_store %arg5[%c0_21, %c0_22], %43 {strides = array<i32>} : memref<8x64xf32, #tpu.memory_space<vmem>>, vector<8x32xf32>,
    %cst_23 = arith.constant 1.000000e+00 : f32
    %45 = vector.broadcast %cst_23 : f32 to vector<8x32xf32>
    %46 = arith.subf %45, %31 : vector<8x32xf32>
    %47 = arith.mulf %46, %38 : vector<8x32xf32>
    %48 = vector.extract_strided_slice %13 {offsets = [0, 32], sizes = [8, 32], strides = [1, 1]} : vector<8x64xf32> to vector<8x32xf32>
    %49 = arith.mulf %31, %48 : vector<8x32xf32>
    %50 = arith.addf %47, %49 : vector<8x32xf32>
    %c0_24 = arith.constant 0 : index
    %c32 = arith.constant 32 : index
    %51 = vector.load %arg5[%c0_24, %c32] : memref<8x64xf32, #tpu.memory_space<vmem>>, vector<8x32xf32>
    tpu.vector_store %arg5[%c0_24, %c32], %50 {strides = array<i32>} : memref<8x64xf32, #tpu.memory_space<vmem>>, vector<8x32xf32>,
    %c8 = arith.constant 8 : index
    %c0_25 = arith.constant 0 : index
    %52 = vector.load %arg6[%c8, %c0_25] : memref<64x256xf32, #tpu.memory_space<vmem>>, vector<8x256xf32>
    %c0_26 = arith.constant 0 : index
    %c0_27 = arith.constant 0 : index
    %53 = vector.load %arg5[%c0_26, %c0_27] : memref<8x64xf32, #tpu.memory_space<vmem>>, vector<8x64xf32>
    %cst_28 = arith.constant dense<0.000000e+00> : vector<8x256xf32>
    %54 = tpu.matmul %53, %1, %cst_28 {dimension_numbers = #tpu.dot_dimension_numbers<[1], [0], [0], [1], [0, 0, 1, 1], [], []>} : vector<8x64xf32>, vector<64x256xf32>, vector<8x256xf32> -> vector<8x256xf32>
    %55 = arith.addf %52, %54 : vector<8x256xf32>
    %56 = vector.extract_strided_slice %55 {offsets = [0, 0], sizes = [8, 128], strides = [1, 1]} : vector<8x256xf32> to vector<8x128xf32>
    %57 = arith.negf %56 : vector<8x128xf32>
    %58 = math.exp %57 : vector<8x128xf32>
    %cst_29 = arith.constant 1.000000e+00 : f32
    %59 = vector.broadcast %cst_29 : f32 to vector<8x128xf32>
    %60 = arith.addf %59, %58 : vector<8x128xf32>
    %61 = arith.divf %59, %60 : vector<8x128xf32>
    %62 = vector.extract_strided_slice %61 {offsets = [0, 0], sizes = [8, 32], strides = [1, 1]} : vector<8x128xf32> to vector<8x32xf32>
    %63 = vector.extract_strided_slice %61 {offsets = [0, 32], sizes = [8, 32], strides = [1, 1]} : vector<8x128xf32> to vector<8x32xf32>
    %64 = vector.extract_strided_slice %61 {offsets = [0, 64], sizes = [8, 32], strides = [1, 1]} : vector<8x128xf32> to vector<8x32xf32>
    %65 = vector.extract_strided_slice %61 {offsets = [0, 96], sizes = [8, 32], strides = [1, 1]} : vector<8x128xf32> to vector<8x32xf32>
    %66 = vector.extract_strided_slice %55 {offsets = [0, 128], sizes = [8, 32], strides = [1, 1]} : vector<8x256xf32> to vector<8x32xf32>
    %67 = arith.negf %66 : vector<8x32xf32>
    %68 = math.exp %67 : vector<8x32xf32>
    %cst_30 = arith.constant 1.000000e+00 : f32
    %69 = vector.broadcast %cst_30 : f32 to vector<8x32xf32>
    %70 = arith.addf %69, %68 : vector<8x32xf32>
    %71 = arith.divf %69, %70 : vector<8x32xf32>
    %72 = vector.extract_strided_slice %55 {offsets = [0, 160], sizes = [8, 32], strides = [1, 1]} : vector<8x256xf32> to vector<8x32xf32>
    %73 = math.tanh %72 : vector<8x32xf32>
    %74 = vector.extract_strided_slice %55 {offsets = [0, 192], sizes = [8, 32], strides = [1, 1]} : vector<8x256xf32> to vector<8x32xf32>
    %75 = vector.extract_strided_slice %55 {offsets = [0, 224], sizes = [8, 32], strides = [1, 1]} : vector<8x256xf32> to vector<8x32xf32>
    %76 = arith.mulf %65, %75 : vector<8x32xf32>
    %77 = arith.addf %74, %76 : vector<8x32xf32>
    %78 = math.tanh %77 : vector<8x32xf32>
    %79 = arith.mulf %63, %41 : vector<8x32xf32>
    %80 = arith.mulf %62, %73 : vector<8x32xf32>
    %81 = arith.addf %79, %80 : vector<8x32xf32>
    %82 = math.tanh %81 : vector<8x32xf32>
    %83 = arith.mulf %64, %82 : vector<8x32xf32>
    %c0_31 = arith.constant 0 : index
    %c0_32 = arith.constant 0 : index
    %84 = vector.load %arg5[%c0_31, %c0_32] : memref<8x64xf32, #tpu.memory_space<vmem>>, vector<8x32xf32>
    tpu.vector_store %arg5[%c0_31, %c0_32], %83 {strides = array<i32>} : memref<8x64xf32, #tpu.memory_space<vmem>>, vector<8x32xf32>,
    %cst_33 = arith.constant 1.000000e+00 : f32
    %85 = vector.broadcast %cst_33 : f32 to vector<8x32xf32>
    %86 = arith.subf %85, %71 : vector<8x32xf32>
    %87 = arith.mulf %86, %78 : vector<8x32xf32>
    %88 = vector.extract_strided_slice %53 {offsets = [0, 32], sizes = [8, 32], strides = [1, 1]} : vector<8x64xf32> to vector<8x32xf32>
    %89 = arith.mulf %71, %88 : vector<8x32xf32>
    %90 = arith.addf %87, %89 : vector<8x32xf32>
    %c0_34 = arith.constant 0 : index
    %c32_35 = arith.constant 32 : index
    %91 = vector.load %arg5[%c0_34, %c32_35] : memref<8x64xf32, #tpu.memory_space<vmem>>, vector<8x32xf32>
    tpu.vector_store %arg5[%c0_34, %c32_35], %90 {strides = array<i32>} : memref<8x64xf32, #tpu.memory_space<vmem>>, vector<8x32xf32>,
    %c16 = arith.constant 16 : index
    %c0_36 = arith.constant 0 : index
    %92 = vector.load %arg6[%c16, %c0_36] : memref<64x256xf32, #tpu.memory_space<vmem>>, vector<8x256xf32>
    %c0_37 = arith.constant 0 : index
    %c0_38 = arith.constant 0 : index
    %93 = vector.load %arg5[%c0_37, %c0_38] : memref<8x64xf32, #tpu.memory_space<vmem>>, vector<8x64xf32>
    %cst_39 = arith.constant dense<0.000000e+00> : vector<8x256xf32>
    %94 = tpu.matmul %93, %1, %cst_39 {dimension_numbers = #tpu.dot_dimension_numbers<[1], [0], [0], [1], [0, 0, 1, 1], [], []>} : vector<8x64xf32>, vector<64x256xf32>, vector<8x256xf32> -> vector<8x256xf32>
    %95 = arith.addf %92, %94 : vector<8x256xf32>
    %96 = vector.extract_strided_slice %95 {offsets = [0, 0], sizes = [8, 128], strides = [1, 1]} : vector<8x256xf32> to vector<8x128xf32>
    %97 = arith.negf %96 : vector<8x128xf32>
    %98 = math.exp %97 : vector<8x128xf32>
    %cst_40 = arith.constant 1.000000e+00 : f32
    %99 = vector.broadcast %cst_40 : f32 to vector<8x128xf32>
    %100 = arith.addf %99, %98 : vector<8x128xf32>
    %101 = arith.divf %99, %100 : vector<8x128xf32>
    %102 = vector.extract_strided_slice %101 {offsets = [0, 0], sizes = [8, 32], strides = [1, 1]} : vector<8x128xf32> to vector<8x32xf32>
    %103 = vector.extract_strided_slice %101 {offsets = [0, 32], sizes = [8, 32], strides = [1, 1]} : vector<8x128xf32> to vector<8x32xf32>
    %104 = vector.extract_strided_slice %101 {offsets = [0, 64], sizes = [8, 32], strides = [1, 1]} : vector<8x128xf32> to vector<8x32xf32>
    %105 = vector.extract_strided_slice %101 {offsets = [0, 96], sizes = [8, 32], strides = [1, 1]} : vector<8x128xf32> to vector<8x32xf32>
    %106 = vector.extract_strided_slice %95 {offsets = [0, 128], sizes = [8, 32], strides = [1, 1]} : vector<8x256xf32> to vector<8x32xf32>
    %107 = arith.negf %106 : vector<8x32xf32>
    %108 = math.exp %107 : vector<8x32xf32>
    %cst_41 = arith.constant 1.000000e+00 : f32
    %109 = vector.broadcast %cst_41 : f32 to vector<8x32xf32>
    %110 = arith.addf %109, %108 : vector<8x32xf32>
    %111 = arith.divf %109, %110 : vector<8x32xf32>
    %112 = vector.extract_strided_slice %95 {offsets = [0, 160], sizes = [8, 32], strides = [1, 1]} : vector<8x256xf32> to vector<8x32xf32>
    %113 = math.tanh %112 : vector<8x32xf32>
    %114 = vector.extract_strided_slice %95 {offsets = [0, 192], sizes = [8, 32], strides = [1, 1]} : vector<8x256xf32> to vector<8x32xf32>
    %115 = vector.extract_strided_slice %95 {offsets = [0, 224], sizes = [8, 32], strides = [1, 1]} : vector<8x256xf32> to vector<8x32xf32>
    %116 = arith.mulf %105, %115 : vector<8x32xf32>
    %117 = arith.addf %114, %116 : vector<8x32xf32>
    %118 = math.tanh %117 : vector<8x32xf32>
    %119 = arith.mulf %103, %81 : vector<8x32xf32>
    %120 = arith.mulf %102, %113 : vector<8x32xf32>
    %121 = arith.addf %119, %120 : vector<8x32xf32>
    %122 = math.tanh %121 : vector<8x32xf32>
    %123 = arith.mulf %104, %122 : vector<8x32xf32>
    %c0_42 = arith.constant 0 : index
    %c0_43 = arith.constant 0 : index
    %124 = vector.load %arg5[%c0_42, %c0_43] : memref<8x64xf32, #tpu.memory_space<vmem>>, vector<8x32xf32>
    tpu.vector_store %arg5[%c0_42, %c0_43], %123 {strides = array<i32>} : memref<8x64xf32, #tpu.memory_space<vmem>>, vector<8x32xf32>,
    %cst_44 = arith.constant 1.000000e+00 : f32
    %125 = vector.broadcast %cst_44 : f32 to vector<8x32xf32>
    %126 = arith.subf %125, %111 : vector<8x32xf32>
    %127 = arith.mulf %126, %118 : vector<8x32xf32>
    %128 = vector.extract_strided_slice %93 {offsets = [0, 32], sizes = [8, 32], strides = [1, 1]} : vector<8x64xf32> to vector<8x32xf32>
    %129 = arith.mulf %111, %128 : vector<8x32xf32>
    %130 = arith.addf %127, %129 : vector<8x32xf32>
    %c0_45 = arith.constant 0 : index
    %c32_46 = arith.constant 32 : index
    %131 = vector.load %arg5[%c0_45, %c32_46] : memref<8x64xf32, #tpu.memory_space<vmem>>, vector<8x32xf32>
    tpu.vector_store %arg5[%c0_45, %c32_46], %130 {strides = array<i32>} : memref<8x64xf32, #tpu.memory_space<vmem>>, vector<8x32xf32>,
    %c24 = arith.constant 24 : index
    %c0_47 = arith.constant 0 : index
    %132 = vector.load %arg6[%c24, %c0_47] : memref<64x256xf32, #tpu.memory_space<vmem>>, vector<8x256xf32>
    %c0_48 = arith.constant 0 : index
    %c0_49 = arith.constant 0 : index
    %133 = vector.load %arg5[%c0_48, %c0_49] : memref<8x64xf32, #tpu.memory_space<vmem>>, vector<8x64xf32>
    %cst_50 = arith.constant dense<0.000000e+00> : vector<8x256xf32>
    %134 = tpu.matmul %133, %1, %cst_50 {dimension_numbers = #tpu.dot_dimension_numbers<[1], [0], [0], [1], [0, 0, 1, 1], [], []>} : vector<8x64xf32>, vector<64x256xf32>, vector<8x256xf32> -> vector<8x256xf32>
    %135 = arith.addf %132, %134 : vector<8x256xf32>
    %136 = vector.extract_strided_slice %135 {offsets = [0, 0], sizes = [8, 128], strides = [1, 1]} : vector<8x256xf32> to vector<8x128xf32>
    %137 = arith.negf %136 : vector<8x128xf32>
    %138 = math.exp %137 : vector<8x128xf32>
    %cst_51 = arith.constant 1.000000e+00 : f32
    %139 = vector.broadcast %cst_51 : f32 to vector<8x128xf32>
    %140 = arith.addf %139, %138 : vector<8x128xf32>
    %141 = arith.divf %139, %140 : vector<8x128xf32>
    %142 = vector.extract_strided_slice %141 {offsets = [0, 0], sizes = [8, 32], strides = [1, 1]} : vector<8x128xf32> to vector<8x32xf32>
    %143 = vector.extract_strided_slice %141 {offsets = [0, 32], sizes = [8, 32], strides = [1, 1]} : vector<8x128xf32> to vector<8x32xf32>
    %144 = vector.extract_strided_slice %141 {offsets = [0, 64], sizes = [8, 32], strides = [1, 1]} : vector<8x128xf32> to vector<8x32xf32>
    %145 = vector.extract_strided_slice %141 {offsets = [0, 96], sizes = [8, 32], strides = [1, 1]} : vector<8x128xf32> to vector<8x32xf32>
    %146 = vector.extract_strided_slice %135 {offsets = [0, 128], sizes = [8, 32], strides = [1, 1]} : vector<8x256xf32> to vector<8x32xf32>
    %147 = arith.negf %146 : vector<8x32xf32>
    %148 = math.exp %147 : vector<8x32xf32>
    %cst_52 = arith.constant 1.000000e+00 : f32
    %149 = vector.broadcast %cst_52 : f32 to vector<8x32xf32>
    %150 = arith.addf %149, %148 : vector<8x32xf32>
    %151 = arith.divf %149, %150 : vector<8x32xf32>
    %152 = vector.extract_strided_slice %135 {offsets = [0, 160], sizes = [8, 32], strides = [1, 1]} : vector<8x256xf32> to vector<8x32xf32>
    %153 = math.tanh %152 : vector<8x32xf32>
    %154 = vector.extract_strided_slice %135 {offsets = [0, 192], sizes = [8, 32], strides = [1, 1]} : vector<8x256xf32> to vector<8x32xf32>
    %155 = vector.extract_strided_slice %135 {offsets = [0, 224], sizes = [8, 32], strides = [1, 1]} : vector<8x256xf32> to vector<8x32xf32>
    %156 = arith.mulf %145, %155 : vector<8x32xf32>
    %157 = arith.addf %154, %156 : vector<8x32xf32>
    %158 = math.tanh %157 : vector<8x32xf32>
    %159 = arith.mulf %143, %121 : vector<8x32xf32>
    %160 = arith.mulf %142, %153 : vector<8x32xf32>
    %161 = arith.addf %159, %160 : vector<8x32xf32>
    %162 = math.tanh %161 : vector<8x32xf32>
    %163 = arith.mulf %144, %162 : vector<8x32xf32>
    %c0_53 = arith.constant 0 : index
    %c0_54 = arith.constant 0 : index
    %164 = vector.load %arg5[%c0_53, %c0_54] : memref<8x64xf32, #tpu.memory_space<vmem>>, vector<8x32xf32>
    tpu.vector_store %arg5[%c0_53, %c0_54], %163 {strides = array<i32>} : memref<8x64xf32, #tpu.memory_space<vmem>>, vector<8x32xf32>,
    %cst_55 = arith.constant 1.000000e+00 : f32
    %165 = vector.broadcast %cst_55 : f32 to vector<8x32xf32>
    %166 = arith.subf %165, %151 : vector<8x32xf32>
    %167 = arith.mulf %166, %158 : vector<8x32xf32>
    %168 = vector.extract_strided_slice %133 {offsets = [0, 32], sizes = [8, 32], strides = [1, 1]} : vector<8x64xf32> to vector<8x32xf32>
    %169 = arith.mulf %151, %168 : vector<8x32xf32>
    %170 = arith.addf %167, %169 : vector<8x32xf32>
    %c0_56 = arith.constant 0 : index
    %c32_57 = arith.constant 32 : index
    %171 = vector.load %arg5[%c0_56, %c32_57] : memref<8x64xf32, #tpu.memory_space<vmem>>, vector<8x32xf32>
    tpu.vector_store %arg5[%c0_56, %c32_57], %170 {strides = array<i32>} : memref<8x64xf32, #tpu.memory_space<vmem>>, vector<8x32xf32>,
    %c32_58 = arith.constant 32 : index
    %c0_59 = arith.constant 0 : index
    %172 = vector.load %arg6[%c32_58, %c0_59] : memref<64x256xf32, #tpu.memory_space<vmem>>, vector<8x256xf32>
    %c0_60 = arith.constant 0 : index
    %c0_61 = arith.constant 0 : index
    %173 = vector.load %arg5[%c0_60, %c0_61] : memref<8x64xf32, #tpu.memory_space<vmem>>, vector<8x64xf32>
    %cst_62 = arith.constant dense<0.000000e+00> : vector<8x256xf32>
    %174 = tpu.matmul %173, %1, %cst_62 {dimension_numbers = #tpu.dot_dimension_numbers<[1], [0], [0], [1], [0, 0, 1, 1], [], []>} : vector<8x64xf32>, vector<64x256xf32>, vector<8x256xf32> -> vector<8x256xf32>
    %175 = arith.addf %172, %174 : vector<8x256xf32>
    %176 = vector.extract_strided_slice %175 {offsets = [0, 0], sizes = [8, 128], strides = [1, 1]} : vector<8x256xf32> to vector<8x128xf32>
    %177 = arith.negf %176 : vector<8x128xf32>
    %178 = math.exp %177 : vector<8x128xf32>
    %cst_63 = arith.constant 1.000000e+00 : f32
    %179 = vector.broadcast %cst_63 : f32 to vector<8x128xf32>
    %180 = arith.addf %179, %178 : vector<8x128xf32>
    %181 = arith.divf %179, %180 : vector<8x128xf32>
    %182 = vector.extract_strided_slice %181 {offsets = [0, 0], sizes = [8, 32], strides = [1, 1]} : vector<8x128xf32> to vector<8x32xf32>
    %183 = vector.extract_strided_slice %181 {offsets = [0, 32], sizes = [8, 32], strides = [1, 1]} : vector<8x128xf32> to vector<8x32xf32>
    %184 = vector.extract_strided_slice %181 {offsets = [0, 64], sizes = [8, 32], strides = [1, 1]} : vector<8x128xf32> to vector<8x32xf32>
    %185 = vector.extract_strided_slice %181 {offsets = [0, 96], sizes = [8, 32], strides = [1, 1]} : vector<8x128xf32> to vector<8x32xf32>
    %186 = vector.extract_strided_slice %175 {offsets = [0, 128], sizes = [8, 32], strides = [1, 1]} : vector<8x256xf32> to vector<8x32xf32>
    %187 = arith.negf %186 : vector<8x32xf32>
    %188 = math.exp %187 : vector<8x32xf32>
    %cst_64 = arith.constant 1.000000e+00 : f32
    %189 = vector.broadcast %cst_64 : f32 to vector<8x32xf32>
    %190 = arith.addf %189, %188 : vector<8x32xf32>
    %191 = arith.divf %189, %190 : vector<8x32xf32>
    %192 = vector.extract_strided_slice %175 {offsets = [0, 160], sizes = [8, 32], strides = [1, 1]} : vector<8x256xf32> to vector<8x32xf32>
    %193 = math.tanh %192 : vector<8x32xf32>
    %194 = vector.extract_strided_slice %175 {offsets = [0, 192], sizes = [8, 32], strides = [1, 1]} : vector<8x256xf32> to vector<8x32xf32>
    %195 = vector.extract_strided_slice %175 {offsets = [0, 224], sizes = [8, 32], strides = [1, 1]} : vector<8x256xf32> to vector<8x32xf32>
    %196 = arith.mulf %185, %195 : vector<8x32xf32>
    %197 = arith.addf %194, %196 : vector<8x32xf32>
    %198 = math.tanh %197 : vector<8x32xf32>
    %199 = arith.mulf %183, %161 : vector<8x32xf32>
    %200 = arith.mulf %182, %193 : vector<8x32xf32>
    %201 = arith.addf %199, %200 : vector<8x32xf32>
    %202 = math.tanh %201 : vector<8x32xf32>
    %203 = arith.mulf %184, %202 : vector<8x32xf32>
    %c0_65 = arith.constant 0 : index
    %c0_66 = arith.constant 0 : index
    %204 = vector.load %arg5[%c0_65, %c0_66] : memref<8x64xf32, #tpu.memory_space<vmem>>, vector<8x32xf32>
    tpu.vector_store %arg5[%c0_65, %c0_66], %203 {strides = array<i32>} : memref<8x64xf32, #tpu.memory_space<vmem>>, vector<8x32xf32>,
    %cst_67 = arith.constant 1.000000e+00 : f32
    %205 = vector.broadcast %cst_67 : f32 to vector<8x32xf32>
    %206 = arith.subf %205, %191 : vector<8x32xf32>
    %207 = arith.mulf %206, %198 : vector<8x32xf32>
    %208 = vector.extract_strided_slice %173 {offsets = [0, 32], sizes = [8, 32], strides = [1, 1]} : vector<8x64xf32> to vector<8x32xf32>
    %209 = arith.mulf %191, %208 : vector<8x32xf32>
    %210 = arith.addf %207, %209 : vector<8x32xf32>
    %c0_68 = arith.constant 0 : index
    %c32_69 = arith.constant 32 : index
    %211 = vector.load %arg5[%c0_68, %c32_69] : memref<8x64xf32, #tpu.memory_space<vmem>>, vector<8x32xf32>
    tpu.vector_store %arg5[%c0_68, %c32_69], %210 {strides = array<i32>} : memref<8x64xf32, #tpu.memory_space<vmem>>, vector<8x32xf32>,
    %c40 = arith.constant 40 : index
    %c0_70 = arith.constant 0 : index
    %212 = vector.load %arg6[%c40, %c0_70] : memref<64x256xf32, #tpu.memory_space<vmem>>, vector<8x256xf32>
    %c0_71 = arith.constant 0 : index
    %c0_72 = arith.constant 0 : index
    %213 = vector.load %arg5[%c0_71, %c0_72] : memref<8x64xf32, #tpu.memory_space<vmem>>, vector<8x64xf32>
    %cst_73 = arith.constant dense<0.000000e+00> : vector<8x256xf32>
    %214 = tpu.matmul %213, %1, %cst_73 {dimension_numbers = #tpu.dot_dimension_numbers<[1], [0], [0], [1], [0, 0, 1, 1], [], []>} : vector<8x64xf32>, vector<64x256xf32>, vector<8x256xf32> -> vector<8x256xf32>
    %215 = arith.addf %212, %214 : vector<8x256xf32>
    %216 = vector.extract_strided_slice %215 {offsets = [0, 0], sizes = [8, 128], strides = [1, 1]} : vector<8x256xf32> to vector<8x128xf32>
    %217 = arith.negf %216 : vector<8x128xf32>
    %218 = math.exp %217 : vector<8x128xf32>
    %cst_74 = arith.constant 1.000000e+00 : f32
    %219 = vector.broadcast %cst_74 : f32 to vector<8x128xf32>
    %220 = arith.addf %219, %218 : vector<8x128xf32>
    %221 = arith.divf %219, %220 : vector<8x128xf32>
    %222 = vector.extract_strided_slice %221 {offsets = [0, 0], sizes = [8, 32], strides = [1, 1]} : vector<8x128xf32> to vector<8x32xf32>
    %223 = vector.extract_strided_slice %221 {offsets = [0, 32], sizes = [8, 32], strides = [1, 1]} : vector<8x128xf32> to vector<8x32xf32>
    %224 = vector.extract_strided_slice %221 {offsets = [0, 64], sizes = [8, 32], strides = [1, 1]} : vector<8x128xf32> to vector<8x32xf32>
    %225 = vector.extract_strided_slice %221 {offsets = [0, 96], sizes = [8, 32], strides = [1, 1]} : vector<8x128xf32> to vector<8x32xf32>
    %226 = vector.extract_strided_slice %215 {offsets = [0, 128], sizes = [8, 32], strides = [1, 1]} : vector<8x256xf32> to vector<8x32xf32>
    %227 = arith.negf %226 : vector<8x32xf32>
    %228 = math.exp %227 : vector<8x32xf32>
    %cst_75 = arith.constant 1.000000e+00 : f32
    %229 = vector.broadcast %cst_75 : f32 to vector<8x32xf32>
    %230 = arith.addf %229, %228 : vector<8x32xf32>
    %231 = arith.divf %229, %230 : vector<8x32xf32>
    %232 = vector.extract_strided_slice %215 {offsets = [0, 160], sizes = [8, 32], strides = [1, 1]} : vector<8x256xf32> to vector<8x32xf32>
    %233 = math.tanh %232 : vector<8x32xf32>
    %234 = vector.extract_strided_slice %215 {offsets = [0, 192], sizes = [8, 32], strides = [1, 1]} : vector<8x256xf32> to vector<8x32xf32>
    %235 = vector.extract_strided_slice %215 {offsets = [0, 224], sizes = [8, 32], strides = [1, 1]} : vector<8x256xf32> to vector<8x32xf32>
    %236 = arith.mulf %225, %235 : vector<8x32xf32>
    %237 = arith.addf %234, %236 : vector<8x32xf32>
    %238 = math.tanh %237 : vector<8x32xf32>
    %239 = arith.mulf %223, %201 : vector<8x32xf32>
    %240 = arith.mulf %222, %233 : vector<8x32xf32>
    %241 = arith.addf %239, %240 : vector<8x32xf32>
    %242 = math.tanh %241 : vector<8x32xf32>
    %243 = arith.mulf %224, %242 : vector<8x32xf32>
    %c0_76 = arith.constant 0 : index
    %c0_77 = arith.constant 0 : index
    %244 = vector.load %arg5[%c0_76, %c0_77] : memref<8x64xf32, #tpu.memory_space<vmem>>, vector<8x32xf32>
    tpu.vector_store %arg5[%c0_76, %c0_77], %243 {strides = array<i32>} : memref<8x64xf32, #tpu.memory_space<vmem>>, vector<8x32xf32>,
    %cst_78 = arith.constant 1.000000e+00 : f32
    %245 = vector.broadcast %cst_78 : f32 to vector<8x32xf32>
    %246 = arith.subf %245, %231 : vector<8x32xf32>
    %247 = arith.mulf %246, %238 : vector<8x32xf32>
    %248 = vector.extract_strided_slice %213 {offsets = [0, 32], sizes = [8, 32], strides = [1, 1]} : vector<8x64xf32> to vector<8x32xf32>
    %249 = arith.mulf %231, %248 : vector<8x32xf32>
    %250 = arith.addf %247, %249 : vector<8x32xf32>
    %c0_79 = arith.constant 0 : index
    %c32_80 = arith.constant 32 : index
    %251 = vector.load %arg5[%c0_79, %c32_80] : memref<8x64xf32, #tpu.memory_space<vmem>>, vector<8x32xf32>
    tpu.vector_store %arg5[%c0_79, %c32_80], %250 {strides = array<i32>} : memref<8x64xf32, #tpu.memory_space<vmem>>, vector<8x32xf32>,
    %c48 = arith.constant 48 : index
    %c0_81 = arith.constant 0 : index
    %252 = vector.load %arg6[%c48, %c0_81] : memref<64x256xf32, #tpu.memory_space<vmem>>, vector<8x256xf32>
    %c0_82 = arith.constant 0 : index
    %c0_83 = arith.constant 0 : index
    %253 = vector.load %arg5[%c0_82, %c0_83] : memref<8x64xf32, #tpu.memory_space<vmem>>, vector<8x64xf32>
    %cst_84 = arith.constant dense<0.000000e+00> : vector<8x256xf32>
    %254 = tpu.matmul %253, %1, %cst_84 {dimension_numbers = #tpu.dot_dimension_numbers<[1], [0], [0], [1], [0, 0, 1, 1], [], []>} : vector<8x64xf32>, vector<64x256xf32>, vector<8x256xf32> -> vector<8x256xf32>
    %255 = arith.addf %252, %254 : vector<8x256xf32>
    %256 = vector.extract_strided_slice %255 {offsets = [0, 0], sizes = [8, 128], strides = [1, 1]} : vector<8x256xf32> to vector<8x128xf32>
    %257 = arith.negf %256 : vector<8x128xf32>
    %258 = math.exp %257 : vector<8x128xf32>
    %cst_85 = arith.constant 1.000000e+00 : f32
    %259 = vector.broadcast %cst_85 : f32 to vector<8x128xf32>
    %260 = arith.addf %259, %258 : vector<8x128xf32>
    %261 = arith.divf %259, %260 : vector<8x128xf32>
    %262 = vector.extract_strided_slice %261 {offsets = [0, 0], sizes = [8, 32], strides = [1, 1]} : vector<8x128xf32> to vector<8x32xf32>
    %263 = vector.extract_strided_slice %261 {offsets = [0, 32], sizes = [8, 32], strides = [1, 1]} : vector<8x128xf32> to vector<8x32xf32>
    %264 = vector.extract_strided_slice %261 {offsets = [0, 64], sizes = [8, 32], strides = [1, 1]} : vector<8x128xf32> to vector<8x32xf32>
    %265 = vector.extract_strided_slice %261 {offsets = [0, 96], sizes = [8, 32], strides = [1, 1]} : vector<8x128xf32> to vector<8x32xf32>
    %266 = vector.extract_strided_slice %255 {offsets = [0, 128], sizes = [8, 32], strides = [1, 1]} : vector<8x256xf32> to vector<8x32xf32>
    %267 = arith.negf %266 : vector<8x32xf32>
    %268 = math.exp %267 : vector<8x32xf32>
    %cst_86 = arith.constant 1.000000e+00 : f32
    %269 = vector.broadcast %cst_86 : f32 to vector<8x32xf32>
    %270 = arith.addf %269, %268 : vector<8x32xf32>
    %271 = arith.divf %269, %270 : vector<8x32xf32>
    %272 = vector.extract_strided_slice %255 {offsets = [0, 160], sizes = [8, 32], strides = [1, 1]} : vector<8x256xf32> to vector<8x32xf32>
    %273 = math.tanh %272 : vector<8x32xf32>
    %274 = vector.extract_strided_slice %255 {offsets = [0, 192], sizes = [8, 32], strides = [1, 1]} : vector<8x256xf32> to vector<8x32xf32>
    %275 = vector.extract_strided_slice %255 {offsets = [0, 224], sizes = [8, 32], strides = [1, 1]} : vector<8x256xf32> to vector<8x32xf32>
    %276 = arith.mulf %265, %275 : vector<8x32xf32>
    %277 = arith.addf %274, %276 : vector<8x32xf32>
    %278 = math.tanh %277 : vector<8x32xf32>
    %279 = arith.mulf %263, %241 : vector<8x32xf32>
    %280 = arith.mulf %262, %273 : vector<8x32xf32>
    %281 = arith.addf %279, %280 : vector<8x32xf32>
    %282 = math.tanh %281 : vector<8x32xf32>
    %283 = arith.mulf %264, %282 : vector<8x32xf32>
    %c0_87 = arith.constant 0 : index
    %c0_88 = arith.constant 0 : index
    %284 = vector.load %arg5[%c0_87, %c0_88] : memref<8x64xf32, #tpu.memory_space<vmem>>, vector<8x32xf32>
    tpu.vector_store %arg5[%c0_87, %c0_88], %283 {strides = array<i32>} : memref<8x64xf32, #tpu.memory_space<vmem>>, vector<8x32xf32>,
    %cst_89 = arith.constant 1.000000e+00 : f32
    %285 = vector.broadcast %cst_89 : f32 to vector<8x32xf32>
    %286 = arith.subf %285, %271 : vector<8x32xf32>
    %287 = arith.mulf %286, %278 : vector<8x32xf32>
    %288 = vector.extract_strided_slice %253 {offsets = [0, 32], sizes = [8, 32], strides = [1, 1]} : vector<8x64xf32> to vector<8x32xf32>
    %289 = arith.mulf %271, %288 : vector<8x32xf32>
    %290 = arith.addf %287, %289 : vector<8x32xf32>
    %c0_90 = arith.constant 0 : index
    %c32_91 = arith.constant 32 : index
    %291 = vector.load %arg5[%c0_90, %c32_91] : memref<8x64xf32, #tpu.memory_space<vmem>>, vector<8x32xf32>
    tpu.vector_store %arg5[%c0_90, %c32_91], %290 {strides = array<i32>} : memref<8x64xf32, #tpu.memory_space<vmem>>, vector<8x32xf32>,
    %c56 = arith.constant 56 : index
    %c0_92 = arith.constant 0 : index
    %292 = vector.load %arg6[%c56, %c0_92] : memref<64x256xf32, #tpu.memory_space<vmem>>, vector<8x256xf32>
    %c0_93 = arith.constant 0 : index
    %c0_94 = arith.constant 0 : index
    %293 = vector.load %arg5[%c0_93, %c0_94] : memref<8x64xf32, #tpu.memory_space<vmem>>, vector<8x64xf32>
    %cst_95 = arith.constant dense<0.000000e+00> : vector<8x256xf32>
    %294 = tpu.matmul %293, %1, %cst_95 {dimension_numbers = #tpu.dot_dimension_numbers<[1], [0], [0], [1], [0, 0, 1, 1], [], []>} : vector<8x64xf32>, vector<64x256xf32>, vector<8x256xf32> -> vector<8x256xf32>
    %295 = arith.addf %292, %294 : vector<8x256xf32>
    %296 = vector.extract_strided_slice %295 {offsets = [0, 0], sizes = [8, 128], strides = [1, 1]} : vector<8x256xf32> to vector<8x128xf32>
    %297 = arith.negf %296 : vector<8x128xf32>
    %298 = math.exp %297 : vector<8x128xf32>
    %cst_96 = arith.constant 1.000000e+00 : f32
    %299 = vector.broadcast %cst_96 : f32 to vector<8x128xf32>
    %300 = arith.addf %299, %298 : vector<8x128xf32>
    %301 = arith.divf %299, %300 : vector<8x128xf32>
    %302 = vector.extract_strided_slice %301 {offsets = [0, 0], sizes = [8, 32], strides = [1, 1]} : vector<8x128xf32> to vector<8x32xf32>
    %303 = vector.extract_strided_slice %301 {offsets = [0, 32], sizes = [8, 32], strides = [1, 1]} : vector<8x128xf32> to vector<8x32xf32>
    %304 = vector.extract_strided_slice %301 {offsets = [0, 64], sizes = [8, 32], strides = [1, 1]} : vector<8x128xf32> to vector<8x32xf32>
    %305 = vector.extract_strided_slice %301 {offsets = [0, 96], sizes = [8, 32], strides = [1, 1]} : vector<8x128xf32> to vector<8x32xf32>
    %306 = vector.extract_strided_slice %295 {offsets = [0, 128], sizes = [8, 32], strides = [1, 1]} : vector<8x256xf32> to vector<8x32xf32>
    %307 = arith.negf %306 : vector<8x32xf32>
    %308 = math.exp %307 : vector<8x32xf32>
    %cst_97 = arith.constant 1.000000e+00 : f32
    %309 = vector.broadcast %cst_97 : f32 to vector<8x32xf32>
    %310 = arith.addf %309, %308 : vector<8x32xf32>
    %311 = arith.divf %309, %310 : vector<8x32xf32>
    %312 = vector.extract_strided_slice %295 {offsets = [0, 160], sizes = [8, 32], strides = [1, 1]} : vector<8x256xf32> to vector<8x32xf32>
    %313 = math.tanh %312 : vector<8x32xf32>
    %314 = vector.extract_strided_slice %295 {offsets = [0, 192], sizes = [8, 32], strides = [1, 1]} : vector<8x256xf32> to vector<8x32xf32>
    %315 = vector.extract_strided_slice %295 {offsets = [0, 224], sizes = [8, 32], strides = [1, 1]} : vector<8x256xf32> to vector<8x32xf32>
    %316 = arith.mulf %305, %315 : vector<8x32xf32>
    %317 = arith.addf %314, %316 : vector<8x32xf32>
    %318 = math.tanh %317 : vector<8x32xf32>
    %319 = arith.mulf %303, %281 : vector<8x32xf32>
    %320 = arith.mulf %302, %313 : vector<8x32xf32>
    %321 = arith.addf %319, %320 : vector<8x32xf32>
    %322 = math.tanh %321 : vector<8x32xf32>
    %323 = arith.mulf %304, %322 : vector<8x32xf32>
    %c0_98 = arith.constant 0 : index
    %c0_99 = arith.constant 0 : index
    %324 = vector.load %arg5[%c0_98, %c0_99] : memref<8x64xf32, #tpu.memory_space<vmem>>, vector<8x32xf32>
    tpu.vector_store %arg5[%c0_98, %c0_99], %323 {strides = array<i32>} : memref<8x64xf32, #tpu.memory_space<vmem>>, vector<8x32xf32>,
    %cst_100 = arith.constant 1.000000e+00 : f32
    %325 = vector.broadcast %cst_100 : f32 to vector<8x32xf32>
    %326 = arith.subf %325, %311 : vector<8x32xf32>
    %327 = arith.mulf %326, %318 : vector<8x32xf32>
    %328 = vector.extract_strided_slice %293 {offsets = [0, 32], sizes = [8, 32], strides = [1, 1]} : vector<8x64xf32> to vector<8x32xf32>
    %329 = arith.mulf %311, %328 : vector<8x32xf32>
    %330 = arith.addf %327, %329 : vector<8x32xf32>
    %c0_101 = arith.constant 0 : index
    %c32_102 = arith.constant 32 : index
    %331 = vector.load %arg5[%c0_101, %c32_102] : memref<8x64xf32, #tpu.memory_space<vmem>>, vector<8x32xf32>
    tpu.vector_store %arg5[%c0_101, %c32_102], %330 {strides = array<i32>} : memref<8x64xf32, #tpu.memory_space<vmem>>, vector<8x32xf32>,
    return
  }
  func.func @transform_0(%arg0: i32) -> (i32, i32, i32) {
    %c0_i32 = arith.constant 0 : i32
    %c0_i32_0 = arith.constant 0 : i32
    %c0_i32_1 = arith.constant 0 : i32
    return %c0_i32, %arg0, %c0_i32_0 : i32, i32, i32
  }
  func.func @transform_1(%arg0: i32) -> (i32, i32) {
    %c0_i32 = arith.constant 0 : i32
    %c0_i32_0 = arith.constant 0 : i32
    %c0_i32_1 = arith.constant 0 : i32
    return %c0_i32, %c0_i32_0 : i32, i32
  }
  func.func @transform_2(%arg0: i32) -> (i32, i32) {
    %c0_i32 = arith.constant 0 : i32
    %c0_i32_0 = arith.constant 0 : i32
    %c0_i32_1 = arith.constant 0 : i32
    return %c0_i32, %c0_i32_0 : i32, i32
  }
  func.func @transform_3(%arg0: i32) -> (i32, i32) {
    %c0_i32 = arith.constant 0 : i32
    %c0_i32_0 = arith.constant 0 : i32
    %c0_i32_1 = arith.constant 0 : i32
    return %c0_i32, %c0_i32_0 : i32, i32
  }
  func.func @transform_4(%arg0: i32) -> (i32, i32) {
    %c0_i32 = arith.constant 0 : i32
    %c0_i32_0 = arith.constant 0 : i32
    return %arg0, %c0_i32 : i32, i32
  }
}

</mosaic_0001>

<bundles_post_ra>
// kernel: tpu_custom_call.1
= control target key start
LH: loop header
LB: loop body
LE: loop exit
PB: predicated region body
PF: predicated region fallthrough
CT: control target
= control target key end

     0   :  { %9 = vsyncpa [#allocation4], 0  ;;  %s1961_s0 = inlined_call_operand.hbm [shape: f32[8,8,16], index: 0, kind: input, shape index: {}]   ;;  %s1962_s1 = inlined_call_operand.hbm [shape: f32[16,256], index: 1, kind: input, shape index: {}]   ;;  %s1963_s2 = inlined_call_operand.hbm [shape: f32[64,256], index: 2, kind: input, shape index: {}]   ;;  %s1964_s3 = inlined_call_operand.vmem [shape: f32[1,256], index: 3, kind: input, shape index: {}]   ;;  %s1965_s4 = inlined_call_operand.hbm [shape: f32[8,64], index: 4, kind: output, shape index: {}]  }
   0x1   :  { %10 = vsyncpa [#allocation7], 0  ;;  %s29_s17 = sshll.u32 %s1962_s1, 4  ;;  %s30_s17 = int_to_ptr.hbm [resolvable:$true] %s29_s17 }
   0x2   :  { %11 = vsyncpa [#allocation5], 0  ;;  %s1574_s18 = smov [#allocation6]   ;;  %s16_s22 = sshll.u32 %s1961_s0, 4  ;;  %s17_s22 = int_to_ptr.hbm [resolvable:$true] %s16_s22 }
   0x3   :  { %s31_s19 = sshll.u32 %s1574_s18, 4  ;;  %s1575_s23 = smov 256   ;;  %s32_s19 = int_to_ptr.vmem [resolvable:$true] %s31_s19 }
   0x4   :  { %s1576_s24 = smov 16   ;;  %s1577_s25 = smov [#allocation3]  }
   0x5   :  { %37 = dma.hbm_to_vmem [thread:$0]  %s30_s17, 512, %s32_s19, [#allocation7], %s1575_s23, %s1575_s23, %s1576_s24  }
   0x6   :  { %s18_s26 = sshll.u32 %s1577_s25, 4  ;;  %s1578_s27 = smov 128   ;;  %s19_s26 = int_to_ptr.vmem [resolvable:$true] %s18_s26 }
   0x7   :  { %s1579_s28 = smov 8   ;;  %s42_s30 = sshll.u32 %s1963_s2, 4  ;;  %s43_s30 = int_to_ptr.hbm [resolvable:$true] %s42_s30 }
   0x8   :  { %24 = dma.hbm_to_vmem [thread:$0]  %s17_s22, 1024, %s19_s26, [#allocation4], %s1578_s27, %s1578_s27, %s1579_s28  }
   0x9   :  { %s1580_s5 = smov [#allocation8]  }
   0xa   :  { %s44_s6 = sshll.u32 %s1580_s5, 4  ;;  %s45_s6 = int_to_ptr.vmem [resolvable:$true] %s44_s6 }
   0xb   :  { %50 = dma.hbm_to_vmem [thread:$0]  %s43_s30, 2048, %s45_s6, [#allocation7], %s1575_s23, %s1575_s23, %s1576_s24  }
   0xc   :  { %1568 = dma.done.wait [#allocation4], 1024  }
   0xd   :  { %1569 = vsyncadd [#allocation4], 4294966272 }
   0xe   :  { %1570 = dma.done.wait [#allocation7], 2560  }
   0xf   :  { %1571 = vsyncadd [#allocation7], 4294964736  ;;  %vm222_vm0 = vcmask 523264   ;;  %v1581_v0 = vmov 0.0   ;;  %v1621_v1 = vld [vmem:[#allocation8 + $0x70] sm:$0xff]  ;;  %v1623_v2 = vld [vmem:[#allocation8 + $0x78] sm:$0xff] }
  0x10   :  { %223 = vst.msk [vmem:[#allocation9] sm:$0xff] %vm222_vm0, %v1581_v0  ;;  %v1625_v3 = vld [vmem:[#allocation8 + $0x60] sm:$0xff]  ;;  %238 = vmatpush.msra.mxu2 %v1621_v1  ;;  %258 = vmatpush.msra.mxu3 %v1623_v2  ;;  %v1629_v4 = vld [vmem:[#allocation8 + $0x68] sm:$0xff]  ;;  %v1631_v5 = vld [vmem:[#allocation8 + $0x50] sm:$0xff]  ;;  %s1582_s0 = smov 96   ;;  %vm99_vm1 = vcmask 130048  }
  0x11   :  { %v1633_v6 = vld [vmem:[#allocation8 + $0x58] sm:$0xff]  ;;  %v1637_v7 = vld [vmem:[#allocation8 + $0x40] sm:$0xff]  ;;  %v1639_v8 = vld [vmem:[#allocation8 + $0x48] sm:$0xff]  ;;  %s1584_s8 = smov 64   ;;  %vm339_vm10 = vcmask 261120   ;;  %vm356_vm11 = vcmask 523520  }
  0x12   :  { %239 = vmatpush.msra.mxu2 %v1625_v3  ;;  %259 = vmatpush.msra.mxu3 %v1629_v4  ;;  %v1643_v9 = vld [vmem:[#allocation8 + $0x30] sm:$0xff]  ;;  %v1645_v12 = vld [vmem:[#allocation8 + $0x38] sm:$0xff]  ;;  %v65_v14 = vld [vmem:[#allocation6] sm:$0xff]  ;;  %s1585_s9 = smov [#allocation9]   ;;  %s1289_s13 = sshll.u32 %s1965_s4, 4  ;;  %s1290_s13 = int_to_ptr.hbm [resolvable:$true] %s1289_s13 }
  0x13   :  { %v67_v11 = vld [vmem:[#allocation6 + $0x10] sm:$0xff]  ;;  %v68_v13 = vld [vmem:[#allocation6 + $0x18] sm:$0xff]  ;;  %v66_v15 = vld [vmem:[#allocation6 + $0x8] sm:$0xff]  ;;  %s1287_s10 = sshll.u32 %s1585_s9, 4  ;;  %s1288_s10 = int_to_ptr.vmem [resolvable:$true] %s1287_s10 }
  0x14   :  { %240 = vmatpush.msra.mxu2 %v1631_v5  ;;  %260 = vmatpush.msra.mxu3 %v1633_v6  ;;  %v85_v16 = vld [vmem:[#allocation3] sm:$0xff]  ;;  %v1652_v18 = vld [vmem:[#allocation8 + $0x28] sm:$0xff]  ;;  %v1656_v19 = vld [vmem:[#allocation8 + $0x10] sm:$0xff] }
  0x15   :  { %138 = vmatpush.msra.mxu0 %v67_v11  ;;  %v1650_v17 = vld [vmem:[#allocation8 + $0x20] sm:$0xff]  ;;  %179 = vmatpush.msra.mxu1 %v68_v13  ;;  %v1658_v20 = vld [vmem:[#allocation8 + $0x18] sm:$0xff]  ;;  %v1665_v22 = vld [vmem:[#allocation8 + $0x8] sm:$0xff] }
  0x16   :  { %241 = vmatpush.msra.mxu2 %v1637_v7  ;;  %261 = vmatpush.msra.mxu3 %v1639_v8  ;;  %v1663_v21 = vld [vmem:[#allocation8] sm:$0xff] }
  0x17   :  { %v226_v10 = vld [vmem:[#allocation9] sm:$0xff]  ;;  %139 = vmatpush.msra.mxu0 %v65_v14  ;;  %180 = vmatpush.msra.mxu1 %v66_v15 }
  0x18   :  { %347 = vrot.lane.b32.xlu2 %v226_v10, %s1582_s0  ;;  %242 = vmatpush.msra.mxu2 %v1643_v9  ;;  %v93_v23 = vld [vmem:[%s1964_s3] sm:$0x3]  ;;  %s1583_s3 = smov 32  }
  0x19   :  { %262 = vmatpush.msra.mxu3 %v1645_v12  ;;  %1300 = vmatmul.msk.f32.vlgmr.msra.gmra.mxu0 %vm99_vm1, %v85_v16  ;;  %v1741_v24 = vperm.slane %v93_v23, 0  ;;  %v1743_v25 = vperm.slane %v93_v23, 1 }
  0x1a   :  { %243 = vmatpush.msra.mxu2 %v1650_v17  ;;  %1308 = vmatmul.msk.f32.vlgmr.msra.gmra.mxu1 %vm99_vm1, %v85_v16 }
  0x1b   :  { %263 = vmatpush.msra.mxu3 %v1652_v18  ;;  %768 = vmatpush.msrb.mxu0 %v1621_v1 }
  0x1c   :  { %244 = vmatpush.msra.mxu2 %v1656_v19  ;;  %788 = vmatpush.msrb.mxu1 %v1623_v2 }
  0x1d   :  { %264 = vmatpush.msra.mxu3 %v1658_v20  ;;  %769 = vmatpush.msrb.mxu0 %v1625_v3 }
  0x1e   :  { %245 = vmatpush.msra.mxu2 %v1663_v21  ;;  %789 = vmatpush.msrb.mxu1 %v1629_v4 }
  0x1f   :  { %265 = vmatpush.msra.mxu3 %v1665_v22  ;;  %1316 = vmatmul.msk.f32.vlgmr.msra.gmra.mxu2 %vm222_vm0, %v226_v10 }
  0x20   :  { %1317 = vmatmul.msk.f32.vlgmr.msra.gmra.mxu3 %vm222_vm0, %v226_v10  ;;  %372 = vmatpush.msrb.mxu2 %v1621_v1 }
  0x21   :  { %392 = vmatpush.msrb.mxu3 %v1623_v2  ;;  %770 = vmatpush.msrb.mxu0 %v1631_v5 }
  0x22   :  { %373 = vmatpush.msrb.mxu2 %v1625_v3  ;;  %790 = vmatpush.msrb.mxu1 %v1633_v6 }
  0x23   :  { %393 = vmatpush.msrb.mxu3 %v1629_v4  ;;  %771 = vmatpush.msrb.mxu0 %v1637_v7 }
  0x24   :  { %374 = vmatpush.msrb.mxu2 %v1631_v5  ;;  %791 = vmatpush.msrb.mxu1 %v1639_v8 }
  0x25   :  { %394 = vmatpush.msrb.mxu3 %v1633_v6  ;;  %772 = vmatpush.msrb.mxu0 %v1643_v9 }
  0x26   :  { %375 = vmatpush.msrb.mxu2 %v1637_v7  ;;  %792 = vmatpush.msrb.mxu1 %v1645_v12 }
  0x27   :  { %395 = vmatpush.msrb.mxu3 %v1639_v8  ;;  %773 = vmatpush.msrb.mxu0 %v1650_v17 }
  0x28   :  { %376 = vmatpush.msrb.mxu2 %v1643_v9  ;;  %793 = vmatpush.msrb.mxu1 %v1652_v18 }
  0x29   :  { %396 = vmatpush.msrb.mxu3 %v1645_v12  ;;  %774 = vmatpush.msrb.mxu0 %v1656_v19 }
  0x2a   :  { %377 = vmatpush.msrb.mxu2 %v1650_v17  ;;  %794 = vmatpush.msrb.mxu1 %v1658_v20 }
  0x2b   :  { %397 = vmatpush.msrb.mxu3 %v1652_v18  ;;  %775 = vmatpush.msrb.mxu0 %v1663_v21 }
  0x2c   :  { %378 = vmatpush.msrb.mxu2 %v1656_v19  ;;  %795 = vmatpush.msrb.mxu1 %v1665_v22 }
  0x2d   :  { %398 = vmatpush.msrb.mxu3 %v1658_v20  ;;  %1032 = vmatpush.msra.mxu0 %v1621_v1 }
  0x2e   :  { %379 = vmatpush.msrb.mxu2 %v1663_v21  ;;  %1052 = vmatpush.msra.mxu1 %v1623_v2 }
  0x2f   :  { %399 = vmatpush.msrb.mxu3 %v1665_v22  ;;  %1033 = vmatpush.msra.mxu0 %v1625_v3 }
  0x30   :  { %504 = vmatpush.msra.mxu2 %v1621_v1  ;;  %1053 = vmatpush.msra.mxu1 %v1629_v4 }
  0x31   :  { %524 = vmatpush.msra.mxu3 %v1623_v2  ;;  %1034 = vmatpush.msra.mxu0 %v1631_v5 }
  0x32   :  { %505 = vmatpush.msra.mxu2 %v1625_v3  ;;  %1054 = vmatpush.msra.mxu1 %v1633_v6 }
  0x33   :  { %525 = vmatpush.msra.mxu3 %v1629_v4  ;;  %1035 = vmatpush.msra.mxu0 %v1637_v7 }
  0x34   :  { %506 = vmatpush.msra.mxu2 %v1631_v5  ;;  %1055 = vmatpush.msra.mxu1 %v1639_v8 }
  0x35   :  { %526 = vmatpush.msra.mxu3 %v1633_v6  ;;  %1036 = vmatpush.msra.mxu0 %v1643_v9 }
  0x36   :  { %507 = vmatpush.msra.mxu2 %v1637_v7  ;;  %1056 = vmatpush.msra.mxu1 %v1645_v12 }
  0x37   :  { %527 = vmatpush.msra.mxu3 %v1639_v8  ;;  %1037 = vmatpush.msra.mxu0 %v1650_v17 }
  0x38   :  { %508 = vmatpush.msra.mxu2 %v1643_v9  ;;  %1057 = vmatpush.msra.mxu1 %v1652_v18 }
  0x39   :  { %528 = vmatpush.msra.mxu3 %v1645_v12  ;;  %1038 = vmatpush.msra.mxu0 %v1656_v19 }
  0x3a   :  { %509 = vmatpush.msra.mxu2 %v1650_v17  ;;  %1058 = vmatpush.msra.mxu1 %v1658_v20 }
  0x3b   :  { %529 = vmatpush.msra.mxu3 %v1652_v18  ;;  %1039 = vmatpush.msra.mxu0 %v1663_v21 }
  0x3c   :  { %510 = vmatpush.msra.mxu2 %v1656_v19  ;;  %1059 = vmatpush.msra.mxu1 %v1665_v22 }
  0x3d   :  { %530 = vmatpush.msra.mxu3 %v1658_v20 }
  0x3e   :  { %511 = vmatpush.msra.mxu2 %v1663_v21 }
  0x3f   :  { %531 = vmatpush.msra.mxu3 %v1665_v22 }
  0x72   :  { %v348_v23 = vpop.permute.xlu2 %347 }
  0x96   :  { %v141_v26 = vpop.f32.mrf.mxu0 }
  0x97   :  { %v182_v27 = vpop.f32.mrf.mxu1  ;;  %v142_v28 = vadd.f32 %v141_v26, %v1741_v24 }
  0x98   :  { %v183_v29 = vadd.f32 %v182_v27, %v1743_v25 }
  0xa2   :  { %v247_v30 = vpop.f32.mrf.mxu2 }
  0xa3   :  { %v267_v31 = vpop.f32.mrf.mxu3  ;;  %v270_v32 = vadd.f32 %v247_v30, %v142_v28 }
  0xa4   :  { %v271_v33 = vadd.f32 %v267_v31, %v183_v29 }
  0xa5   :  { %v1318_v34 = vmul.f32 -1.442695, %v270_v32 }
  0xa6   :  { %1360 = vtanh.f32 %v271_v33  ;;  %v1319_v54 = vmul.f32 -1.442695, %v271_v33 }
  0xa7   :  { %1362 = vpow2.f32 %v1318_v34 }
  0xac   :  { %v1361_v35 = vpop.eup %1360 }
  0xad   :  { %320 = vrot.lane.b32.xlu0 %v1361_v35, %s1582_s0  ;;  %v1363_v36 = vpop.eup %1362 }
  0xae   :  { %v275_v37 = vadd.f32 1.0, %v1363_v36 }
  0xb0   :  { %1364 = vrcp.f32 %v275_v37  ;;  %v287_v40 = vand.u32 2147483648, %v275_v37  ;;  %vm281_vm2 = vweird.f32 %v275_v37  ;;  %v285_v42 = vand.u32 2147483647, %v275_v37 }
  0xb2   :  { %v288_v44 = vor.u32 1.1754944e-38, %v287_v40  ;;  %vm286_vm5 = vcmp.eq.f32.partialorder %v285_v42, 8.507059e+37 }
  0xb6   :  { %v1365_v38 = vpop.eup %1364 }
  0xb7   :  { %v277_v39 = vmul.f32 %v1365_v38, %v275_v37  ;;  %vm282_vm3 = vweird.f32 %v1365_v38 }
  0xb8   :  { %vm283_vm4 = vmor %vm281_vm2, %vm282_vm3 }
  0xb9   :  { %v278_v41 = vsub.f32 1.0, %v277_v39 }
  0xbb   :  { %v279_v43 = vmul.f32 %v1365_v38, %v278_v41 }
  0xbd   :  { %v280_v45 = vadd.f32 %v1365_v38, %v279_v43 }
  0xbf   :  { %v284_v46 = vsel %vm283_vm4, %v1365_v38, %v280_v45 }
  0xc0   :  { %v289_v47 = vsel %vm286_vm5, %v288_v44, %v284_v46 }
  0xc1   :  { %v311_v48 = vmul.f32 %v289_v47, %v271_v33  ;;  %v318_v57 = vmul.f32 0.0, %v289_v47 }
  0xc3   :  { %313 = vrot.lane.b32.xlu0 %v311_v48, %s1582_s0 }
 0x11f   :  { %v321_v49 = vpop.permute.xlu0 %320 }
 0x120   :  { %v323_v50 = vmul.f32 %v321_v49, %v289_v47 }
 0x122   :  { %325 = vrot.lane.b32.xlu1 %v323_v50, %s1583_s3 }
 0x135   :  { %v314_v51 = vpop.permute.xlu0 %313 }
 0x136   :  { %v316_v52 = vadd.f32 %v314_v51, %v271_v33  ;;  %v86_v33 = vld [vmem:[#allocation3 + $0x8] sm:$0xff] }
 0x137   :  { %1301 = vmatmul.msk.f32.gmra.mxu0 %vm99_vm1, %v86_v33  ;;  %1309 = vmatmul.msk.f32.gmra.mxu1 %vm99_vm1, %v86_v33 }
 0x138   :  { %1366 = vtanh.f32 %v316_v52 }
 0x139   :  { %1368 = vpow2.f32 %v1319_v54 }
 0x13e   :  { %v1367_v53 = vpop.eup %1366 }
 0x13f   :  { %343 = vrot.lane.b32.xlu1 %v1367_v53, %s1584_s8  ;;  %v1369_v55 = vpop.eup %1368 }
 0x140   :  { %v294_v56 = vadd.f32 1.0, %v1369_v55 }
 0x142   :  { %1370 = vrcp.f32 %v294_v56  ;;  %v306_v11 = vand.u32 2147483648, %v294_v56  ;;  %vm300_vm7 = vweird.f32 %v294_v56  ;;  %v304_v13 = vand.u32 2147483647, %v294_v56 }
 0x144   :  { %v307_v15 = vor.u32 1.1754944e-38, %v306_v11  ;;  %vm305_vm9 = vcmp.eq.f32.partialorder %v304_v13, 8.507059e+37 }
 0x148   :  { %v1371_v60 = vpop.eup %1370 }
 0x149   :  { %v296_v61 = vmul.f32 %v1371_v60, %v294_v56  ;;  %vm301_vm6 = vweird.f32 %v1371_v60 }
 0x14a   :  { %vm302_vm8 = vmor %vm300_vm7, %vm301_vm6 }
 0x14b   :  { %v297_v63 = vsub.f32 1.0, %v296_v61 }
 0x14d   :  { %v298_v0 = vmul.f32 %v1371_v60, %v297_v63 }
 0x14f   :  { %v299_v10 = vadd.f32 %v1371_v60, %v298_v0 }
 0x151   :  { %v303_v14 = vsel %vm302_vm8, %v1371_v60, %v299_v10 }
 0x152   :  { %v308_v16 = vsel %vm305_vm9, %v307_v15, %v303_v14 }
 0x153   :  { %v341_v26 = vsub.f32 1.0, %v308_v16  ;;  %v350_v28 = vmul.f32 %v348_v23, %v308_v16 }
 0x194   :  { %v326_v58 = vpop.permute.xlu1 %325 }
 0x195   :  { %v1751_v59 = vadd.f32 %v326_v58, %v318_v57 }
 0x197   :  { %1372 = vtanh.f32 %v1751_v59 }
 0x19d   :  { %v1373_v62 = vpop.eup %1372 }
 0x19e   :  { %331 = vrot.lane.b32.xlu2 %v1373_v62, %s1583_s3 }
 0x1b1   :  { %v344_v27 = vpop.permute.xlu1 %343 }
 0x1b2   :  { %v346_v29 = vmul.f32 %v344_v27, %v341_v26 }
 0x1b4   :  { %v351_v30 = vadd.f32 %v350_v28, %v346_v29  ;;  %v144_v37 = vpop.f32.mrf.mxu0  ;;  %v185_v38 = vpop.f32.mrf.mxu1 }
 0x1b5   :  { %v145_v39 = vadd.f32 %v144_v37, %v1741_v24  ;;  %v186_v40 = vadd.f32 %v185_v38, %v1743_v25 }
 0x1b6   :  { %353 = vrot.lane.b32.xlu1 %v351_v30, %s1583_s3 }
 0x1f8   :  { %v332_v31 = vpop.permute.xlu2 %331 }
 0x1f9   :  { %v334_v32 = vmul.f32 %v332_v31, %v289_v47 }
 0x1fb   :  { %336 = vrot.lane.b32.xlu0 %v334_v32, %s1584_s8 }
 0x228   :  { %v354_v35 = vpop.permute.xlu1 %353 }
 0x26d   :  { %v337_v34 = vpop.permute.xlu0 %336 }
 0x26e   :  { %340 = vst.msk [vmem:[#allocation9] sm:$0xff] %vm339_vm10, %v337_v34 }
 0x26f   :  { %357 = vst.msk [vmem:[#allocation9] sm:$0xff] %vm356_vm11, %v354_v35 }
 0x276   :  { %v360_v36 = vld [vmem:[#allocation9] sm:$0xff] }
 0x277   :  { %1320 = vmatmul.msk.f32.vlgmr.msrb.gmra.mxu2 %vm222_vm0, %v360_v36  ;;  %1321 = vmatmul.msk.f32.vlgmr.msrb.gmra.mxu3 %vm222_vm0, %v360_v36 }
 0x278   :  { %636 = vmatpush.msrb.mxu2 %v1621_v1  ;;  %656 = vmatpush.msrb.mxu3 %v1623_v2 }
 0x27a   :  { %637 = vmatpush.msrb.mxu2 %v1625_v3  ;;  %657 = vmatpush.msrb.mxu3 %v1629_v4 }
 0x27c   :  { %638 = vmatpush.msrb.mxu2 %v1631_v5  ;;  %658 = vmatpush.msrb.mxu3 %v1633_v6 }
 0x27e   :  { %639 = vmatpush.msrb.mxu2 %v1637_v7  ;;  %659 = vmatpush.msrb.mxu3 %v1639_v8 }
 0x280   :  { %640 = vmatpush.msrb.mxu2 %v1643_v9  ;;  %660 = vmatpush.msrb.mxu3 %v1645_v12 }
 0x282   :  { %641 = vmatpush.msrb.mxu2 %v1650_v17  ;;  %661 = vmatpush.msrb.mxu3 %v1652_v18 }
 0x284   :  { %642 = vmatpush.msrb.mxu2 %v1656_v19  ;;  %662 = vmatpush.msrb.mxu3 %v1658_v20 }
 0x286   :  { %643 = vmatpush.msrb.mxu2 %v1663_v21  ;;  %663 = vmatpush.msrb.mxu3 %v1665_v22 }
 0x2fa   :  { %v381_v41 = vpop.f32.mrf.mxu2  ;;  %v401_v42 = vpop.f32.mrf.mxu3 }
 0x2fb   :  { %v404_v43 = vadd.f32 %v381_v41, %v145_v39  ;;  %v405_v44 = vadd.f32 %v401_v42, %v186_v40 }
 0x2fd   :  { %v1322_v45 = vmul.f32 -1.442695, %v404_v43  ;;  %1374 = vtanh.f32 %v405_v44  ;;  %v1323_v11 = vmul.f32 -1.442695, %v405_v44 }
 0x2ff   :  { %1376 = vpow2.f32 %v1322_v45 }
 0x303   :  { %v1375_v46 = vpop.eup %1374 }
 0x304   :  { %454 = vrot.lane.b32.xlu2 %v1375_v46, %s1582_s0 }
 0x305   :  { %v1377_v47 = vpop.eup %1376 }
 0x306   :  { %v409_v48 = vadd.f32 1.0, %v1377_v47 }
 0x308   :  { %1378 = vrcp.f32 %v409_v48  ;;  %v421_v52 = vand.u32 2147483648, %v409_v48  ;;  %v419_v54 = vand.u32 2147483647, %v409_v48  ;;  %vm415_vm13 = vweird.f32 %v409_v48 }
 0x30a   :  { %v422_v56 = vor.u32 1.1754944e-38, %v421_v52  ;;  %vm420_vm15 = vcmp.eq.f32.partialorder %v419_v54, 8.507059e+37 }
 0x30e   :  { %v1379_v49 = vpop.eup %1378 }
 0x30f   :  { %v411_v50 = vmul.f32 %v1379_v49, %v409_v48  ;;  %vm416_vm12 = vweird.f32 %v1379_v49 }
 0x310   :  { %vm417_vm14 = vmor %vm415_vm13, %vm416_vm12 }
 0x311   :  { %v412_v51 = vsub.f32 1.0, %v411_v50 }
 0x313   :  { %v413_v53 = vmul.f32 %v1379_v49, %v412_v51 }
 0x315   :  { %v414_v55 = vadd.f32 %v1379_v49, %v413_v53 }
 0x317   :  { %v418_v57 = vsel %vm417_vm14, %v1379_v49, %v414_v55 }
 0x318   :  { %v423_v58 = vsel %vm420_vm15, %v422_v56, %v418_v57 }
 0x319   :  { %v445_v60 = vmul.f32 %v423_v58, %v405_v44  ;;  %v452_v15 = vmul.f32 %v423_v58, %v1751_v59 }
 0x31b   :  { %447 = vrot.lane.b32.xlu0 %v445_v60, %s1582_s0 }
 0x323   :  { %480 = vrot.lane.b32.xlu0 %v360_v36, %s1582_s0 }
 0x35e   :  { %v455_v61 = vpop.permute.xlu2 %454 }
 0x35f   :  { %v457_v62 = vmul.f32 %v455_v61, %v423_v58 }
 0x361   :  { %459 = vrot.lane.b32.xlu1 %v457_v62, %s1583_s3 }
 0x38d   :  { %v448_v63 = vpop.permute.xlu0 %447 }
 0x38e   :  { %v450_v0 = vadd.f32 %v448_v63, %v405_v44  ;;  %v87_v44 = vld [vmem:[#allocation3 + $0x10] sm:$0xff] }
 0x38f   :  { %1302 = vmatmul.msk.f32.gmra.mxu0 %vm99_vm1, %v87_v44  ;;  %1310 = vmatmul.msk.f32.gmra.mxu1 %vm99_vm1, %v87_v44 }
 0x390   :  { %1380 = vtanh.f32 %v450_v0 }
 0x391   :  { %1382 = vpow2.f32 %v1323_v11 }
 0x395   :  { %v481_v36 = vpop.permute.xlu0 %480 }
 0x396   :  { %v1381_v10 = vpop.eup %1380 }
 0x397   :  { %476 = vrot.lane.b32.xlu2 %v1381_v10, %s1584_s8  ;;  %v1383_v13 = vpop.eup %1382 }
 0x398   :  { %v428_v14 = vadd.f32 1.0, %v1383_v13 }
 0x39a   :  { %1384 = vrcp.f32 %v428_v14  ;;  %v440_v32 = vand.u32 2147483648, %v428_v14  ;;  %vm434_vm3 = vweird.f32 %v428_v14  ;;  %v438_v33 = vand.u32 2147483647, %v428_v14 }
 0x39c   :  { %v441_v59 = vor.u32 1.1754944e-38, %v440_v32  ;;  %vm439_vm5 = vcmp.eq.f32.partialorder %v438_v33, 8.507059e+37 }
 0x3a0   :  { %v1385_v26 = vpop.eup %1384 }
 0x3a1   :  { %v430_v27 = vmul.f32 %v1385_v26, %v428_v14  ;;  %vm435_vm2 = vweird.f32 %v1385_v26 }
 0x3a2   :  { %vm436_vm4 = vmor %vm434_vm3, %vm435_vm2 }
 0x3a3   :  { %v431_v29 = vsub.f32 1.0, %v430_v27 }
 0x3a5   :  { %v432_v30 = vmul.f32 %v1385_v26, %v431_v29 }
 0x3a7   :  { %v433_v31 = vadd.f32 %v1385_v26, %v432_v30 }
 0x3a9   :  { %v437_v34 = vsel %vm436_vm4, %v1385_v26, %v433_v31 }
 0x3aa   :  { %v442_v35 = vsel %vm439_vm5, %v441_v59, %v437_v34 }
 0x3ab   :  { %v474_v37 = vsub.f32 1.0, %v442_v35  ;;  %v483_v39 = vmul.f32 %v481_v36, %v442_v35 }
 0x3d3   :  { %v460_v16 = vpop.permute.xlu1 %459 }
 0x3d4   :  { %v1787_v23 = vadd.f32 %v460_v16, %v452_v15 }
 0x3d6   :  { %1386 = vtanh.f32 %v1787_v23 }
 0x3dc   :  { %v1387_v28 = vpop.eup %1386 }
 0x3dd   :  { %465 = vrot.lane.b32.xlu1 %v1387_v28, %s1583_s3 }
 0x3f1   :  { %v477_v38 = vpop.permute.xlu2 %476 }
 0x3f2   :  { %v479_v40 = vmul.f32 %v477_v38, %v474_v37 }
 0x3f4   :  { %v484_v41 = vadd.f32 %v483_v39, %v479_v40 }
 0x3f6   :  { %486 = vrot.lane.b32.xlu0 %v484_v41, %s1583_s3 }
 0x40c   :  { %v147_v48 = vpop.f32.mrf.mxu0  ;;  %v188_v49 = vpop.f32.mrf.mxu1 }
 0x40d   :  { %v148_v50 = vadd.f32 %v147_v48, %v1741_v24  ;;  %v189_v51 = vadd.f32 %v188_v49, %v1743_v25 }
 0x44f   :  { %v466_v42 = vpop.permute.xlu1 %465 }
 0x450   :  { %v468_v43 = vmul.f32 %v466_v42, %v423_v58 }
 0x452   :  { %470 = vrot.lane.b32.xlu2 %v468_v43, %s1584_s8 }
 0x468   :  { %v487_v46 = vpop.permute.xlu0 %486 }
 0x4ac   :  { %v471_v45 = vpop.permute.xlu2 %470 }
 0x4ad   :  { %473 = vst.msk [vmem:[#allocation9] sm:$0xff] %vm339_vm10, %v471_v45 }
 0x4ae   :  { %489 = vst.msk [vmem:[#allocation9] sm:$0xff] %vm356_vm11, %v487_v46 }
 0x4b5   :  { %v492_v47 = vld [vmem:[#allocation9] sm:$0xff] }
 0x4b6   :  { %1324 = vmatmul.msk.f32.vlgmr.msra.gmra.mxu2 %vm222_vm0, %v492_v47  ;;  %1325 = vmatmul.msk.f32.vlgmr.msra.gmra.mxu3 %vm222_vm0, %v492_v47 }
 0x4b7   :  { %900 = vmatpush.msra.mxu2 %v1621_v1  ;;  %920 = vmatpush.msra.mxu3 %v1623_v2 }
 0x4b9   :  { %901 = vmatpush.msra.mxu2 %v1625_v3  ;;  %921 = vmatpush.msra.mxu3 %v1629_v4 }
 0x4bb   :  { %902 = vmatpush.msra.mxu2 %v1631_v5  ;;  %922 = vmatpush.msra.mxu3 %v1633_v6 }
 0x4bd   :  { %903 = vmatpush.msra.mxu2 %v1637_v7  ;;  %923 = vmatpush.msra.mxu3 %v1639_v8 }
 0x4bf   :  { %904 = vmatpush.msra.mxu2 %v1643_v9  ;;  %924 = vmatpush.msra.mxu3 %v1645_v12 }
 0x4c1   :  { %905 = vmatpush.msra.mxu2 %v1650_v17  ;;  %925 = vmatpush.msra.mxu3 %v1652_v18 }
 0x4c3   :  { %906 = vmatpush.msra.mxu2 %v1656_v19  ;;  %926 = vmatpush.msra.mxu3 %v1658_v20 }
 0x4c5   :  { %907 = vmatpush.msra.mxu2 %v1663_v21  ;;  %927 = vmatpush.msra.mxu3 %v1665_v22 }
 0x539   :  { %v513_v52 = vpop.f32.mrf.mxu2  ;;  %v533_v53 = vpop.f32.mrf.mxu3 }
 0x53a   :  { %v536_v54 = vadd.f32 %v513_v52, %v148_v50  ;;  %v537_v55 = vadd.f32 %v533_v53, %v189_v51 }
 0x53c   :  { %v1326_v56 = vmul.f32 -1.442695, %v536_v54  ;;  %1388 = vtanh.f32 %v537_v55  ;;  %v1327_v32 = vmul.f32 -1.442695, %v537_v55 }
 0x53e   :  { %1390 = vpow2.f32 %v1326_v56 }
 0x542   :  { %v1389_v57 = vpop.eup %1388 }
 0x543   :  { %586 = vrot.lane.b32.xlu1 %v1389_v57, %s1582_s0 }
 0x544   :  { %v1391_v58 = vpop.eup %1390 }
 0x545   :  { %v541_v60 = vadd.f32 1.0, %v1391_v58 }
 0x547   :  { %1392 = vrcp.f32 %v541_v60  ;;  %v553_v0 = vand.u32 2147483648, %v541_v60  ;;  %v551_v11 = vand.u32 2147483647, %v541_v60  ;;  %vm547_vm7 = vweird.f32 %v541_v60 }
 0x549   :  { %v554_v14 = vor.u32 1.1754944e-38, %v553_v0  ;;  %vm552_vm9 = vcmp.eq.f32.partialorder %v551_v11, 8.507059e+37 }
 0x54d   :  { %v1393_v61 = vpop.eup %1392 }
 0x54e   :  { %v543_v62 = vmul.f32 %v1393_v61, %v541_v60  ;;  %vm548_vm6 = vweird.f32 %v1393_v61 }
 0x54f   :  { %vm549_vm8 = vmor %vm547_vm7, %vm548_vm6 }
 0x550   :  { %v544_v63 = vsub.f32 1.0, %v543_v62 }
 0x552   :  { %v545_v10 = vmul.f32 %v1393_v61, %v544_v63 }
 0x554   :  { %v546_v13 = vadd.f32 %v1393_v61, %v545_v10 }
 0x556   :  { %v550_v15 = vsel %vm549_vm8, %v1393_v61, %v546_v13 }
 0x557   :  { %v555_v16 = vsel %vm552_vm9, %v554_v14, %v550_v15 }
 0x558   :  { %v577_v26 = vmul.f32 %v555_v16, %v537_v55  ;;  %v584_v42 = vmul.f32 %v555_v16, %v1787_v23 }
 0x55a   :  { %579 = vrot.lane.b32.xlu2 %v577_v26, %s1582_s0 }
 0x562   :  { %612 = vrot.lane.b32.xlu2 %v492_v47, %s1582_s0 }
 0x5b4   :  { %v580_v27 = vpop.permute.xlu2 %579 }
 0x5b5   :  { %v582_v28 = vadd.f32 %v580_v27, %v537_v55  ;;  %v587_v29 = vpop.permute.xlu1 %586  ;;  %v88_v55 = vld [vmem:[#allocation3 + $0x18] sm:$0xff] }
 0x5b6   :  { %v589_v30 = vmul.f32 %v587_v29, %v555_v16  ;;  %1303 = vmatmul.msk.f32.gmra.mxu0 %vm99_vm1, %v88_v55  ;;  %1311 = vmatmul.msk.f32.gmra.mxu1 %vm99_vm1, %v88_v55 }
 0x5b7   :  { %1394 = vtanh.f32 %v582_v28 }
 0x5b8   :  { %591 = vrot.lane.b32.xlu0 %v589_v30, %s1583_s3  ;;  %1396 = vpow2.f32 %v1327_v32 }
 0x5bc   :  { %v613_v47 = vpop.permute.xlu2 %612 }
 0x5bd   :  { %v1395_v31 = vpop.eup %1394 }
 0x5be   :  { %608 = vrot.lane.b32.xlu1 %v1395_v31, %s1584_s8  ;;  %v1397_v33 = vpop.eup %1396 }
 0x5bf   :  { %v560_v34 = vadd.f32 1.0, %v1397_v33 }
 0x5c1   :  { %1398 = vrcp.f32 %v560_v34  ;;  %v572_v39 = vand.u32 2147483648, %v560_v34  ;;  %vm566_vm13 = vweird.f32 %v560_v34  ;;  %v570_v40 = vand.u32 2147483647, %v560_v34 }
 0x5c3   :  { %v573_v43 = vor.u32 1.1754944e-38, %v572_v39  ;;  %vm571_vm15 = vcmp.eq.f32.partialorder %v570_v40, 8.507059e+37 }
 0x5c7   :  { %v1399_v59 = vpop.eup %1398 }
 0x5c8   :  { %v562_v35 = vmul.f32 %v1399_v59, %v560_v34  ;;  %vm567_vm12 = vweird.f32 %v1399_v59 }
 0x5c9   :  { %vm568_vm14 = vmor %vm566_vm13, %vm567_vm12 }
 0x5ca   :  { %v563_v36 = vsub.f32 1.0, %v562_v35 }
 0x5cc   :  { %v564_v37 = vmul.f32 %v1399_v59, %v563_v36 }
 0x5ce   :  { %v565_v38 = vadd.f32 %v1399_v59, %v564_v37 }
 0x5d0   :  { %v569_v41 = vsel %vm568_vm14, %v1399_v59, %v565_v38 }
 0x5d1   :  { %v574_v46 = vsel %vm571_vm15, %v573_v43, %v569_v41 }
 0x5d2   :  { %v606_v48 = vsub.f32 1.0, %v574_v46  ;;  %v615_v50 = vmul.f32 %v613_v47, %v574_v46 }
 0x62a   :  { %v592_v44 = vpop.permute.xlu0 %591 }
 0x62b   :  { %v1823_v45 = vadd.f32 %v592_v44, %v584_v42 }
 0x62d   :  { %1400 = vtanh.f32 %v1823_v45 }
 0x630   :  { %v609_v49 = vpop.permute.xlu1 %608 }
 0x631   :  { %v611_v51 = vmul.f32 %v609_v49, %v606_v48 }
 0x633   :  { %v1401_v52 = vpop.eup %1400  ;;  %v616_v53 = vadd.f32 %v615_v50, %v611_v51  ;;  %v89_v51 = vld [vmem:[#allocation3 + $0x20] sm:$0xff] }
 0x634   :  { %597 = vrot.lane.b32.xlu0 %v1401_v52, %s1583_s3  ;;  %1304 = vmatmul.msk.f32.gmra.mxu0 %vm99_vm1, %v89_v51  ;;  %v90_v52 = vld [vmem:[#allocation3 + $0x28] sm:$0xff] }
 0x635   :  { %618 = vrot.lane.b32.xlu2 %v616_v53, %s1583_s3  ;;  %1312 = vmatmul.msk.f32.gmra.mxu1 %vm99_vm1, %v89_v51  ;;  %v91_v53 = vld [vmem:[#allocation3 + $0x30] sm:$0xff] }
 0x63c   :  { %1305 = vmatmul.msk.f32.gmra.mxu0 %vm99_vm1, %v90_v52 }
 0x63d   :  { %1313 = vmatmul.msk.f32.gmra.mxu1 %vm99_vm1, %v90_v52 }
 0x644   :  { %1306 = vmatmul.msk.f32.gmra.mxu0 %vm99_vm1, %v91_v53 }
 0x645   :  { %1314 = vmatmul.msk.f32.gmra.mxu1 %vm99_vm1, %v91_v53 }
 0x68f   :  { %v619_v57 = vpop.permute.xlu2 %618 }
 0x6a6   :  { %v598_v23 = vpop.permute.xlu0 %597 }
 0x6a7   :  { %v600_v54 = vmul.f32 %v598_v23, %v555_v16  ;;  %v92_v23 = vld [vmem:[#allocation3 + $0x38] sm:$0xff] }
 0x6a8   :  { %1307 = vmatmul.msk.f32.gmra.mxu0 %vm99_vm1, %v92_v23  ;;  %1315 = vmatmul.msk.f32.gmra.mxu1 %vm99_vm1, %v92_v23 }
 0x6a9   :  { %602 = vrot.lane.b32.xlu1 %v600_v54, %s1584_s8 }
 0x71b   :  { %v603_v56 = vpop.permute.xlu1 %602 }
 0x71c   :  { %605 = vst.msk [vmem:[#allocation9] sm:$0xff] %vm339_vm10, %v603_v56 }
 0x71d   :  { %621 = vst.msk [vmem:[#allocation9] sm:$0xff] %vm356_vm11, %v619_v57 }
 0x724   :  { %v624_v58 = vld [vmem:[#allocation9] sm:$0xff] }
 0x725   :  { %1328 = vmatmul.msk.f32.vlgmr.msrb.gmra.mxu2 %vm222_vm0, %v624_v58  ;;  %1329 = vmatmul.msk.f32.vlgmr.msrb.gmra.mxu3 %vm222_vm0, %v624_v58 }
 0x726   :  { %1164 = vmatpush.msrb.mxu2 %v1621_v1  ;;  %1184 = vmatpush.msrb.mxu3 %v1623_v2  ;;  %v150_v1 = vpop.f32.mrf.mxu0  ;;  %v191_v2 = vpop.f32.mrf.mxu1 }
 0x728   :  { %1165 = vmatpush.msrb.mxu2 %v1625_v3  ;;  %1185 = vmatpush.msrb.mxu3 %v1629_v4  ;;  %v151_v3 = vadd.f32 %v150_v1, %v1741_v24  ;;  %v192_v4 = vadd.f32 %v191_v2, %v1743_v25 }
 0x72a   :  { %1166 = vmatpush.msrb.mxu2 %v1631_v5  ;;  %1186 = vmatpush.msrb.mxu3 %v1633_v6 }
 0x72c   :  { %1167 = vmatpush.msrb.mxu2 %v1637_v7  ;;  %1187 = vmatpush.msrb.mxu3 %v1639_v8 }
 0x72e   :  { %1168 = vmatpush.msrb.mxu2 %v1643_v9  ;;  %1188 = vmatpush.msrb.mxu3 %v1645_v12  ;;  %v153_v57 = vpop.f32.mrf.mxu0 }
 0x730   :  { %1169 = vmatpush.msrb.mxu2 %v1650_v17  ;;  %1189 = vmatpush.msrb.mxu3 %v1652_v18 }
 0x732   :  { %1170 = vmatpush.msrb.mxu2 %v1656_v19  ;;  %1190 = vmatpush.msrb.mxu3 %v1658_v20 }
 0x734   :  { %1171 = vmatpush.msrb.mxu2 %v1663_v21  ;;  %1191 = vmatpush.msrb.mxu3 %v1665_v22 }
 0x736   :  { %v1877_v1 = vpop.f32.mrf.mxu0 }
 0x7a8   :  { %v645_v5 = vpop.f32.mrf.mxu2  ;;  %v665_v6 = vpop.f32.mrf.mxu3 }
 0x7a9   :  { %v668_v7 = vadd.f32 %v645_v5, %v151_v3  ;;  %v669_v8 = vadd.f32 %v665_v6, %v192_v4  ;;  %v1881_v3 = vpop.f32.mrf.mxu0 }
 0x7ab   :  { %v1330_v9 = vmul.f32 -1.442695, %v668_v7  ;;  %1402 = vtanh.f32 %v669_v8  ;;  %v1331_v30 = vmul.f32 -1.442695, %v669_v8  ;;  %v154_v7 = vadd.f32 %v153_v57, %v1741_v24 }
 0x7ac   :  { %v157_v57 = vadd.f32 %v1877_v1, %v1741_v24 }
 0x7ad   :  { %1404 = vpow2.f32 %v1330_v9 }
 0x7b1   :  { %v1403_v12 = vpop.eup %1402  ;;  %v1885_v5 = vpop.f32.mrf.mxu0 }
 0x7b2   :  { %718 = vrot.lane.b32.xlu0 %v1403_v12, %s1582_s0 }
 0x7b3   :  { %v1405_v17 = vpop.eup %1404 }
 0x7b4   :  { %v673_v18 = vadd.f32 1.0, %v1405_v17 }
 0x7b6   :  { %1406 = vrcp.f32 %v673_v18  ;;  %v685_v22 = vand.u32 2147483648, %v673_v18  ;;  %v683_v61 = vand.u32 2147483647, %v673_v18  ;;  %vm679_vm3 = vweird.f32 %v673_v18 }
 0x7b8   :  { %v686_v63 = vor.u32 1.1754944e-38, %v685_v22  ;;  %vm684_vm5 = vcmp.eq.f32.partialorder %v683_v61, 8.507059e+37 }
 0x7bc   :  { %v1407_v19 = vpop.eup %1406 }
 0x7bd   :  { %v675_v20 = vmul.f32 %v1407_v19, %v673_v18  ;;  %vm680_vm2 = vweird.f32 %v1407_v19 }
 0x7be   :  { %vm681_vm4 = vmor %vm679_vm3, %vm680_vm2 }
 0x7bf   :  { %v676_v21 = vsub.f32 1.0, %v675_v20 }
 0x7c1   :  { %v677_v60 = vmul.f32 %v1407_v19, %v676_v21 }
 0x7c3   :  { %v678_v62 = vadd.f32 %v1407_v19, %v677_v60 }
 0x7c5   :  { %v682_v0 = vsel %vm681_vm4, %v1407_v19, %v678_v62 }
 0x7c6   :  { %v687_v10 = vsel %vm684_vm5, %v686_v63, %v682_v0 }
 0x7c7   :  { %v709_v11 = vmul.f32 %v687_v10, %v669_v8  ;;  %v716_v27 = vmul.f32 %v687_v10, %v1823_v45 }
 0x7c9   :  { %711 = vrot.lane.b32.xlu1 %v709_v11, %s1582_s0 }
 0x7d1   :  { %744 = vrot.lane.b32.xlu1 %v624_v58, %s1582_s0  ;;  %v194_v58 = vpop.f32.mrf.mxu1 }
 0x7d9   :  { %v1879_v2 = vpop.f32.mrf.mxu1 }
 0x7e1   :  { %v1883_v4 = vpop.f32.mrf.mxu1 }
 0x7e9   :  { %v1887_v6 = vpop.f32.mrf.mxu1 }
 0x824   :  { %v719_v13 = vpop.permute.xlu0 %718 }
 0x825   :  { %v721_v14 = vmul.f32 %v719_v13, %v687_v10 }
 0x827   :  { %723 = vrot.lane.b32.xlu2 %v721_v14, %s1583_s3 }
 0x83b   :  { %v712_v15 = vpop.permute.xlu1 %711 }
 0x83c   :  { %v714_v16 = vadd.f32 %v712_v15, %v669_v8  ;;  %v195_v8 = vadd.f32 %v194_v58, %v1743_v25  ;;  %v198_v58 = vadd.f32 %v1879_v2, %v1743_v25 }
 0x83e   :  { %1408 = vtanh.f32 %v714_v16 }
 0x843   :  { %v745_v43 = vpop.permute.xlu1 %744 }
 0x844   :  { %v1409_v26 = vpop.eup %1408 }
 0x845   :  { %740 = vrot.lane.b32.xlu0 %v1409_v26, %s1584_s8 }
 0x881   :  { %v724_v28 = vpop.permute.xlu2 %723 }
 0x882   :  { %v1859_v29 = vadd.f32 %v724_v28, %v716_v27 }
 0x884   :  { %1410 = vtanh.f32 %v1859_v29 }
 0x885   :  { %1412 = vpow2.f32 %v1331_v30 }
 0x88a   :  { %v1411_v31 = vpop.eup %1410 }
 0x88b   :  { %729 = vrot.lane.b32.xlu2 %v1411_v31, %s1583_s3  ;;  %v1413_v32 = vpop.eup %1412 }
 0x88c   :  { %v692_v33 = vadd.f32 1.0, %v1413_v32 }
 0x88e   :  { %1414 = vrcp.f32 %v692_v33  ;;  %v704_v38 = vand.u32 2147483648, %v692_v33  ;;  %vm698_vm7 = vweird.f32 %v692_v33  ;;  %v702_v39 = vand.u32 2147483647, %v692_v33 }
 0x890   :  { %v705_v41 = vor.u32 1.1754944e-38, %v704_v38  ;;  %vm703_vm9 = vcmp.eq.f32.partialorder %v702_v39, 8.507059e+37 }
 0x894   :  { %v1415_v34 = vpop.eup %1414 }
 0x895   :  { %v694_v59 = vmul.f32 %v1415_v34, %v692_v33  ;;  %vm699_vm6 = vweird.f32 %v1415_v34 }
 0x896   :  { %vm700_vm8 = vmor %vm698_vm7, %vm699_vm6 }
 0x897   :  { %v695_v35 = vsub.f32 1.0, %v694_v59 }
 0x899   :  { %v696_v36 = vmul.f32 %v1415_v34, %v695_v35 }
 0x89b   :  { %v697_v37 = vadd.f32 %v1415_v34, %v696_v36 }
 0x89d   :  { %v701_v40 = vsel %vm700_vm8, %v1415_v34, %v697_v37 }
 0x89e   :  { %v706_v42 = vsel %vm703_vm9, %v705_v41, %v701_v40 }
 0x89f   :  { %v738_v44 = vsub.f32 1.0, %v706_v42  ;;  %v747_v46 = vmul.f32 %v745_v43, %v706_v42 }
 0x8b7   :  { %v741_v45 = vpop.permute.xlu0 %740 }
 0x8b8   :  { %v743_v47 = vmul.f32 %v741_v45, %v738_v44 }
 0x8ba   :  { %v748_v48 = vadd.f32 %v747_v46, %v743_v47 }
 0x8bc   :  { %750 = vrot.lane.b32.xlu1 %v748_v48, %s1583_s3 }
 0x8e5   :  { %v730_v49 = vpop.permute.xlu2 %729 }
 0x8e6   :  { %v732_v50 = vmul.f32 %v730_v49, %v687_v10 }
 0x8e8   :  { %734 = vrot.lane.b32.xlu0 %v732_v50, %s1584_s8 }
 0x92e   :  { %v751_v55 = vpop.permute.xlu1 %750 }
 0x95a   :  { %v735_v54 = vpop.permute.xlu0 %734 }
 0x95b   :  { %737 = vst.msk [vmem:[#allocation9] sm:$0xff] %vm339_vm10, %v735_v54 }
 0x95c   :  { %753 = vst.msk [vmem:[#allocation9] sm:$0xff] %vm356_vm11, %v751_v55 }
 0x963   :  { %v756_v56 = vld [vmem:[#allocation9] sm:$0xff] }
 0x964   :  { %1332 = vmatmul.msk.f32.vlgmr.msrb.gmra.mxu0 %vm222_vm0, %v756_v56  ;;  %1333 = vmatmul.msk.f32.vlgmr.msrb.gmra.mxu1 %vm222_vm0, %v756_v56 }
 0x9e1   :  { %v777_v9 = vpop.f32.mrf.mxu0  ;;  %v797_v12 = vpop.f32.mrf.mxu1 }
 0x9e2   :  { %v800_v17 = vadd.f32 %v777_v9, %v154_v7  ;;  %v801_v18 = vadd.f32 %v797_v12, %v195_v8 }
 0x9e4   :  { %v1334_v19 = vmul.f32 -1.442695, %v800_v17  ;;  %1416 = vtanh.f32 %v801_v18  ;;  %v1335_v32 = vmul.f32 -1.442695, %v801_v18 }
 0x9e6   :  { %1418 = vpow2.f32 %v1334_v19 }
 0x9ea   :  { %v1417_v20 = vpop.eup %1416 }
 0x9eb   :  { %850 = vrot.lane.b32.xlu2 %v1417_v20, %s1582_s0 }
 0x9ec   :  { %v1419_v21 = vpop.eup %1418 }
 0x9ed   :  { %v805_v22 = vadd.f32 1.0, %v1419_v21 }
 0x9ef   :  { %1420 = vrcp.f32 %v805_v22  ;;  %v817_v63 = vand.u32 2147483648, %v805_v22  ;;  %v815_v10 = vand.u32 2147483647, %v805_v22  ;;  %vm811_vm12 = vweird.f32 %v805_v22 }
 0x9f1   :  { %v818_v13 = vor.u32 1.1754944e-38, %v817_v63  ;;  %vm816_vm14 = vcmp.eq.f32.partialorder %v815_v10, 8.507059e+37 }
 0x9f5   :  { %v1421_v60 = vpop.eup %1420 }
 0x9f6   :  { %v807_v61 = vmul.f32 %v1421_v60, %v805_v22  ;;  %vm812_vm1 = vweird.f32 %v1421_v60 }
 0x9f7   :  { %vm813_vm13 = vmor %vm811_vm12, %vm812_vm1 }
 0x9f8   :  { %v808_v62 = vsub.f32 1.0, %v807_v61 }
 0x9fa   :  { %v809_v0 = vmul.f32 %v1421_v60, %v808_v62 }
 0x9fc   :  { %v810_v11 = vadd.f32 %v1421_v60, %v809_v0 }
 0x9fe   :  { %v814_v14 = vsel %vm813_vm13, %v1421_v60, %v810_v11 }
 0x9ff   :  { %v819_v15 = vsel %vm816_vm14, %v818_v13, %v814_v14 }
 0xa00   :  { %v841_v16 = vmul.f32 %v819_v15, %v801_v18  ;;  %v848_v59 = vmul.f32 %v819_v15, %v1859_v29 }
 0xa02   :  { %843 = vrot.lane.b32.xlu0 %v841_v16, %s1582_s0 }
 0xa0a   :  { %876 = vrot.lane.b32.xlu0 %v756_v56, %s1582_s0 }
 0xa45   :  { %v851_v26 = vpop.permute.xlu2 %850 }
 0xa46   :  { %v853_v27 = vmul.f32 %v851_v26, %v819_v15 }
 0xa48   :  { %855 = vrot.lane.b32.xlu1 %v853_v27, %s1583_s3 }
 0xa74   :  { %v844_v28 = vpop.permute.xlu0 %843 }
 0xa75   :  { %v846_v30 = vadd.f32 %v844_v28, %v801_v18 }
 0xa77   :  { %1422 = vtanh.f32 %v846_v30 }
 0xa78   :  { %1424 = vpow2.f32 %v1335_v32 }
 0xa7c   :  { %v877_v47 = vpop.permute.xlu0 %876 }
 0xa7d   :  { %v1423_v31 = vpop.eup %1422 }
 0xa7e   :  { %872 = vrot.lane.b32.xlu2 %v1423_v31, %s1584_s8  ;;  %v1425_v33 = vpop.eup %1424 }
 0xa7f   :  { %v824_v34 = vadd.f32 1.0, %v1425_v33 }
 0xa81   :  { %1426 = vrcp.f32 %v824_v34  ;;  %v836_v43 = vand.u32 2147483648, %v824_v34  ;;  %vm830_vm2 = vweird.f32 %v824_v34  ;;  %v834_v44 = vand.u32 2147483647, %v824_v34 }
 0xa83   :  { %v837_v29 = vor.u32 1.1754944e-38, %v836_v43  ;;  %vm835_vm4 = vcmp.eq.f32.partialorder %v834_v44, 8.507059e+37 }
 0xa87   :  { %v1427_v37 = vpop.eup %1426 }
 0xa88   :  { %v826_v38 = vmul.f32 %v1427_v37, %v824_v34  ;;  %vm831_vm15 = vweird.f32 %v1427_v37 }
 0xa89   :  { %vm832_vm3 = vmor %vm830_vm2, %vm831_vm15 }
 0xa8a   :  { %v827_v40 = vsub.f32 1.0, %v826_v38 }
 0xa8c   :  { %v828_v41 = vmul.f32 %v1427_v37, %v827_v40 }
 0xa8e   :  { %v829_v42 = vadd.f32 %v1427_v37, %v828_v41 }
 0xa90   :  { %v833_v45 = vsel %vm832_vm3, %v1427_v37, %v829_v42 }
 0xa91   :  { %v838_v46 = vsel %vm835_vm4, %v837_v29, %v833_v45 }
 0xa92   :  { %v870_v48 = vsub.f32 1.0, %v838_v46  ;;  %v879_v50 = vmul.f32 %v877_v47, %v838_v46 }
 0xaba   :  { %v856_v35 = vpop.permute.xlu1 %855 }
 0xabb   :  { %v1897_v36 = vadd.f32 %v856_v35, %v848_v59 }
 0xabd   :  { %1428 = vtanh.f32 %v1897_v36 }
 0xac3   :  { %v1429_v39 = vpop.eup %1428 }
 0xac4   :  { %861 = vrot.lane.b32.xlu1 %v1429_v39, %s1583_s3 }
 0xad8   :  { %v873_v49 = vpop.permute.xlu2 %872 }
 0xad9   :  { %v875_v51 = vmul.f32 %v873_v49, %v870_v48 }
 0xadb   :  { %v880_v52 = vadd.f32 %v879_v50, %v875_v51 }
 0xadd   :  { %882 = vrot.lane.b32.xlu0 %v880_v52, %s1583_s3 }
 0xb36   :  { %v862_v53 = vpop.permute.xlu1 %861 }
 0xb37   :  { %v864_v23 = vmul.f32 %v862_v53, %v819_v15 }
 0xb39   :  { %866 = vrot.lane.b32.xlu2 %v864_v23, %s1584_s8  ;;  %v160_v23 = vadd.f32 %v1881_v3, %v1741_v24 }
 0xb4f   :  { %v883_v55 = vpop.permute.xlu0 %882 }
 0xb93   :  { %v867_v54 = vpop.permute.xlu2 %866 }
 0xb94   :  { %869 = vst.msk [vmem:[#allocation9] sm:$0xff] %vm339_vm10, %v867_v54  ;;  %v201_v54 = vadd.f32 %v1883_v4, %v1743_v25 }
 0xb95   :  { %885 = vst.msk [vmem:[#allocation9] sm:$0xff] %vm356_vm11, %v883_v55 }
 0xb9c   :  { %v888_v56 = vld [vmem:[#allocation9] sm:$0xff] }
 0xb9d   :  { %1336 = vmatmul.msk.f32.vlgmr.msra.gmra.mxu2 %vm222_vm0, %v888_v56  ;;  %1337 = vmatmul.msk.f32.vlgmr.msra.gmra.mxu3 %vm222_vm0, %v888_v56 }
 0xc20   :  { %v909_v7 = vpop.f32.mrf.mxu2  ;;  %v929_v8 = vpop.f32.mrf.mxu3 }
 0xc21   :  { %v932_v9 = vadd.f32 %v909_v7, %v157_v57  ;;  %v933_v12 = vadd.f32 %v929_v8, %v198_v58 }
 0xc23   :  { %v1338_v17 = vmul.f32 -1.442695, %v932_v9  ;;  %1430 = vtanh.f32 %v933_v12  ;;  %v1339_v27 = vmul.f32 -1.442695, %v933_v12 }
 0xc25   :  { %1432 = vpow2.f32 %v1338_v17 }
 0xc29   :  { %v1431_v18 = vpop.eup %1430 }
 0xc2a   :  { %982 = vrot.lane.b32.xlu1 %v1431_v18, %s1582_s0 }
 0xc2b   :  { %v1433_v19 = vpop.eup %1432 }
 0xc2c   :  { %v937_v20 = vadd.f32 1.0, %v1433_v19 }
 0xc2e   :  { %1434 = vrcp.f32 %v937_v20  ;;  %v949_v1 = vand.u32 2147483648, %v937_v20  ;;  %v947_v2 = vand.u32 2147483647, %v937_v20  ;;  %vm943_vm6 = vweird.f32 %v937_v20 }
 0xc30   :  { %v950_v63 = vor.u32 1.1754944e-38, %v949_v1  ;;  %vm948_vm8 = vcmp.eq.f32.partialorder %v947_v2, 8.507059e+37 }
 0xc34   :  { %v1435_v21 = vpop.eup %1434 }
 0xc35   :  { %v939_v22 = vmul.f32 %v1435_v21, %v937_v20  ;;  %vm944_vm5 = vweird.f32 %v1435_v21 }
 0xc36   :  { %vm945_vm7 = vmor %vm943_vm6, %vm944_vm5 }
 0xc37   :  { %v940_v60 = vsub.f32 1.0, %v939_v22 }
 0xc39   :  { %v941_v61 = vmul.f32 %v1435_v21, %v940_v60 }
 0xc3b   :  { %v942_v62 = vadd.f32 %v1435_v21, %v941_v61 }
 0xc3d   :  { %v946_v0 = vsel %vm945_vm7, %v1435_v21, %v942_v62 }
 0xc3e   :  { %v951_v10 = vsel %vm948_vm8, %v950_v63, %v946_v0 }
 0xc3f   :  { %v973_v11 = vmul.f32 %v951_v10, %v933_v12  ;;  %v980_v39 = vmul.f32 %v951_v10, %v1897_v36 }
 0xc41   :  { %975 = vrot.lane.b32.xlu2 %v973_v11, %s1582_s0 }
 0xc49   :  { %1008 = vrot.lane.b32.xlu2 %v888_v56, %s1582_s0 }
 0xc9b   :  { %v976_v13 = vpop.permute.xlu2 %975 }
 0xc9c   :  { %v978_v14 = vadd.f32 %v976_v13, %v933_v12  ;;  %v983_v15 = vpop.permute.xlu1 %982 }
 0xc9d   :  { %v985_v16 = vmul.f32 %v983_v15, %v951_v10 }
 0xc9e   :  { %1436 = vtanh.f32 %v978_v14 }
 0xc9f   :  { %987 = vrot.lane.b32.xlu0 %v985_v16, %s1583_s3  ;;  %1438 = vpow2.f32 %v1339_v27 }
 0xca3   :  { %v1009_v44 = vpop.permute.xlu2 %1008 }
 0xca4   :  { %v1437_v26 = vpop.eup %1436 }
 0xca5   :  { %1004 = vrot.lane.b32.xlu1 %v1437_v26, %s1584_s8  ;;  %v1439_v28 = vpop.eup %1438 }
 0xca6   :  { %v956_v30 = vadd.f32 1.0, %v1439_v28 }
 0xca8   :  { %1440 = vrcp.f32 %v956_v30  ;;  %v968_v35 = vand.u32 2147483648, %v956_v30  ;;  %vm962_vm1 = vweird.f32 %v956_v30  ;;  %v966_v37 = vand.u32 2147483647, %v956_v30 }
 0xcaa   :  { %v969_v40 = vor.u32 1.1754944e-38, %v968_v35  ;;  %vm967_vm13 = vcmp.eq.f32.partialorder %v966_v37, 8.507059e+37 }
 0xcae   :  { %v1441_v31 = vpop.eup %1440 }
 0xcaf   :  { %v958_v32 = vmul.f32 %v1441_v31, %v956_v30  ;;  %vm963_vm9 = vweird.f32 %v1441_v31 }
 0xcb0   :  { %vm964_vm12 = vmor %vm962_vm1, %vm963_vm9 }
 0xcb1   :  { %v959_v33 = vsub.f32 1.0, %v958_v32 }
 0xcb3   :  { %v960_v34 = vmul.f32 %v1441_v31, %v959_v33 }
 0xcb5   :  { %v961_v59 = vadd.f32 %v1441_v31, %v960_v34 }
 0xcb7   :  { %v965_v38 = vsel %vm964_vm12, %v1441_v31, %v961_v59 }
 0xcb8   :  { %v970_v43 = vsel %vm967_vm13, %v969_v40, %v965_v38 }
 0xcb9   :  { %v1002_v45 = vsub.f32 1.0, %v970_v43  ;;  %v1011_v46 = vmul.f32 %v1009_v44, %v970_v43 }
 0xd11   :  { %v988_v41 = vpop.permute.xlu0 %987 }
 0xd12   :  { %v990_v42 = vadd.f32 %v988_v41, %v980_v39 }
 0xd14   :  { %1442 = vtanh.f32 %v990_v42 }
 0xd17   :  { %v1005_v29 = vpop.permute.xlu1 %1004 }
 0xd18   :  { %v1007_v47 = vmul.f32 %v1005_v29, %v1002_v45 }
 0xd1a   :  { %v1443_v48 = vpop.eup %1442  ;;  %v1012_v49 = vadd.f32 %v1011_v46, %v1007_v47 }
 0xd1b   :  { %993 = vrot.lane.b32.xlu0 %v1443_v48, %s1583_s3 }
 0xd1c   :  { %1014 = vrot.lane.b32.xlu2 %v1012_v49, %s1583_s3  ;;  %v163_v49 = vadd.f32 %v1885_v5, %v1741_v24 }
 0xd76   :  { %v1015_v52 = vpop.permute.xlu2 %1014 }
 0xd8d   :  { %v994_v50 = vpop.permute.xlu0 %993 }
 0xd8e   :  { %v996_v51 = vmul.f32 %v994_v50, %v951_v10  ;;  %v204_v50 = vadd.f32 %v1887_v6, %v1743_v25 }
 0xd90   :  { %998 = vrot.lane.b32.xlu1 %v996_v51, %s1584_s8 }
 0xe02   :  { %v999_v36 = vpop.permute.xlu1 %998 }
 0xe03   :  { %1001 = vst.msk [vmem:[#allocation9] sm:$0xff] %vm339_vm10, %v999_v36 }
 0xe04   :  { %1017 = vst.msk [vmem:[#allocation9] sm:$0xff] %vm356_vm11, %v1015_v52 }
 0xe0b   :  { %v1020_v53 = vld [vmem:[#allocation9] sm:$0xff] }
 0xe0c   :  { %1340 = vmatmul.msk.f32.vlgmr.msra.gmra.mxu0 %vm222_vm0, %v1020_v53  ;;  %1341 = vmatmul.msk.f32.vlgmr.msra.gmra.mxu1 %vm222_vm0, %v1020_v53 }
 0xe89   :  { %v1041_v55 = vpop.f32.mrf.mxu0  ;;  %v1061_v56 = vpop.f32.mrf.mxu1 }
 0xe8a   :  { %v1064_v57 = vadd.f32 %v1041_v55, %v160_v23  ;;  %v1065_v58 = vadd.f32 %v1061_v56, %v201_v54 }
 0xe8c   :  { %v1342_v7 = vmul.f32 -1.442695, %v1064_v57  ;;  %1444 = vtanh.f32 %v1065_v58  ;;  %v1343_v15 = vmul.f32 -1.442695, %v1065_v58 }
 0xe8e   :  { %1446 = vpow2.f32 %v1342_v7 }
 0xe92   :  { %v1445_v8 = vpop.eup %1444 }
 0xe93   :  { %1114 = vrot.lane.b32.xlu0 %v1445_v8, %s1582_s0 }
 0xe94   :  { %v1447_v9 = vpop.eup %1446 }
 0xe95   :  { %v1069_v12 = vadd.f32 1.0, %v1447_v9 }
 0xe97   :  { %1448 = vrcp.f32 %v1069_v12  ;;  %v1081_v3 = vand.u32 2147483648, %v1069_v12  ;;  %v1079_v4 = vand.u32 2147483647, %v1069_v12  ;;  %vm1075_vm15 = vweird.f32 %v1069_v12 }
 0xe99   :  { %v1082_v22 = vor.u32 1.1754944e-38, %v1081_v3  ;;  %vm1080_vm3 = vcmp.eq.f32.partialorder %v1079_v4, 8.507059e+37 }
 0xe9d   :  { %v1449_v17 = vpop.eup %1448 }
 0xe9e   :  { %v1071_v18 = vmul.f32 %v1449_v17, %v1069_v12  ;;  %vm1076_vm14 = vweird.f32 %v1449_v17 }
 0xe9f   :  { %vm1077_vm2 = vmor %vm1075_vm15, %vm1076_vm14 }
 0xea0   :  { %v1072_v19 = vsub.f32 1.0, %v1071_v18 }
 0xea2   :  { %v1073_v20 = vmul.f32 %v1449_v17, %v1072_v19 }
 0xea4   :  { %v1074_v21 = vadd.f32 %v1449_v17, %v1073_v20 }
 0xea6   :  { %v1078_v60 = vsel %vm1077_vm2, %v1449_v17, %v1074_v21 }
 0xea7   :  { %v1083_v1 = vsel %vm1080_vm3, %v1082_v22, %v1078_v60 }
 0xea8   :  { %v1105_v61 = vmul.f32 %v1083_v1, %v1065_v58  ;;  %v1112_v11 = vmul.f32 %v1083_v1, %v990_v42 }
 0xeaa   :  { %1107 = vrot.lane.b32.xlu1 %v1105_v61, %s1582_s0 }
 0xeb2   :  { %1140 = vrot.lane.b32.xlu1 %v1020_v53, %s1582_s0 }
 0xf05   :  { %v1115_v2 = vpop.permute.xlu0 %1114 }
 0xf06   :  { %v1117_v62 = vmul.f32 %v1115_v2, %v1083_v1 }
 0xf08   :  { %1119 = vrot.lane.b32.xlu2 %v1117_v62, %s1583_s3 }
 0xf1c   :  { %v1108_v63 = vpop.permute.xlu1 %1107 }
 0xf1d   :  { %v1110_v0 = vadd.f32 %v1108_v63, %v1065_v58 }
 0xf1f   :  { %1450 = vtanh.f32 %v1110_v0 }
 0xf24   :  { %v1141_v39 = vpop.permute.xlu1 %1140 }
 0xf25   :  { %v1451_v10 = vpop.eup %1450 }
 0xf26   :  { %1136 = vrot.lane.b32.xlu0 %v1451_v10, %s1584_s8 }
 0xf62   :  { %v1120_v13 = vpop.permute.xlu2 %1119 }
 0xf63   :  { %v1933_v14 = vadd.f32 %v1120_v13, %v1112_v11 }
 0xf65   :  { %1452 = vtanh.f32 %v1933_v14 }
 0xf66   :  { %1454 = vpow2.f32 %v1343_v15 }
 0xf6b   :  { %v1453_v16 = vpop.eup %1452 }
 0xf6c   :  { %1125 = vrot.lane.b32.xlu2 %v1453_v16, %s1583_s3  ;;  %v1455_v26 = vpop.eup %1454 }
 0xf6d   :  { %v1088_v27 = vadd.f32 1.0, %v1455_v26 }
 0xf6f   :  { %1456 = vrcp.f32 %v1088_v27  ;;  %v1100_v34 = vand.u32 2147483648, %v1088_v27  ;;  %vm1094_vm5 = vweird.f32 %v1088_v27  ;;  %v1098_v59 = vand.u32 2147483647, %v1088_v27 }
 0xf71   :  { %v1101_v37 = vor.u32 1.1754944e-38, %v1100_v34  ;;  %vm1099_vm7 = vcmp.eq.f32.partialorder %v1098_v59, 8.507059e+37 }
 0xf75   :  { %v1457_v28 = vpop.eup %1456 }
 0xf76   :  { %v1090_v30 = vmul.f32 %v1457_v28, %v1088_v27  ;;  %vm1095_vm4 = vweird.f32 %v1457_v28 }
 0xf77   :  { %vm1096_vm6 = vmor %vm1094_vm5, %vm1095_vm4 }
 0xf78   :  { %v1091_v31 = vsub.f32 1.0, %v1090_v30 }
 0xf7a   :  { %v1092_v32 = vmul.f32 %v1457_v28, %v1091_v31 }
 0xf7c   :  { %v1093_v33 = vadd.f32 %v1457_v28, %v1092_v32 }
 0xf7e   :  { %v1097_v35 = vsel %vm1096_vm6, %v1457_v28, %v1093_v33 }
 0xf7f   :  { %v1102_v38 = vsel %vm1099_vm7, %v1101_v37, %v1097_v35 }
 0xf80   :  { %v1134_v40 = vsub.f32 1.0, %v1102_v38  ;;  %v1143_v42 = vmul.f32 %v1141_v39, %v1102_v38 }
 0xf98   :  { %v1137_v41 = vpop.permute.xlu0 %1136 }
 0xf99   :  { %v1139_v43 = vmul.f32 %v1137_v41, %v1134_v40 }
 0xf9b   :  { %v1144_v44 = vadd.f32 %v1143_v42, %v1139_v43 }
 0xf9d   :  { %1146 = vrot.lane.b32.xlu1 %v1144_v44, %s1583_s3 }
 0xfc6   :  { %v1126_v45 = vpop.permute.xlu2 %1125 }
 0xfc7   :  { %v1128_v29 = vmul.f32 %v1126_v45, %v1083_v1 }
 0xfc9   :  { %1130 = vrot.lane.b32.xlu0 %v1128_v29, %s1584_s8 }
0x100f   :  { %v1147_v47 = vpop.permute.xlu1 %1146 }
0x103b   :  { %v1131_v46 = vpop.permute.xlu0 %1130 }
0x103c   :  { %1133 = vst.msk [vmem:[#allocation9] sm:$0xff] %vm339_vm10, %v1131_v46 }
0x103d   :  { %1149 = vst.msk [vmem:[#allocation9] sm:$0xff] %vm356_vm11, %v1147_v47 }
0x1044   :  { %v1152_v48 = vld [vmem:[#allocation9] sm:$0xff] }
0x1045   :  { %1344 = vmatmul.msk.f32.vlgmr.msrb.gmra.mxu2 %vm222_vm0, %v1152_v48  ;;  %1345 = vmatmul.msk.f32.vlgmr.msrb.gmra.mxu3 %vm222_vm0, %v1152_v48 }
0x10c8   :  { %v1173_v51 = vpop.f32.mrf.mxu2  ;;  %v1193_v36 = vpop.f32.mrf.mxu3 }
0x10c9   :  { %v1196_v52 = vadd.f32 %v1173_v51, %v163_v49  ;;  %v1197_v53 = vadd.f32 %v1193_v36, %v204_v50 }
0x10cb   :  { %v1346_v23 = vmul.f32 -1.442695, %v1196_v52  ;;  %1458 = vtanh.f32 %v1197_v53  ;;  %v1347_v21 = vmul.f32 -1.442695, %v1197_v53 }
0x10cd   :  { %1460 = vpow2.f32 %v1346_v23 }
0x10d1   :  { %v1459_v54 = vpop.eup %1458 }
0x10d2   :  { %1246 = vrot.lane.b32.xlu2 %v1459_v54, %s1582_s0 }
0x10d3   :  { %v1461_v55 = vpop.eup %1460 }
0x10d4   :  { %v1201_v56 = vadd.f32 1.0, %v1461_v55 }
0x10d6   :  { %1462 = vrcp.f32 %v1201_v56  ;;  %v1213_v24 = vand.u32 2147483648, %v1201_v56  ;;  %v1211_v25 = vand.u32 2147483647, %v1201_v56  ;;  %vm1207_vm8 = vweird.f32 %v1201_v56 }
0x10d8   :  { %v1214_v8 = vor.u32 1.1754944e-38, %v1213_v24  ;;  %vm1212_vm1 = vcmp.eq.f32.partialorder %v1211_v25, 8.507059e+37 }
0x10dc   :  { %v1463_v57 = vpop.eup %1462 }
0x10dd   :  { %v1203_v58 = vmul.f32 %v1463_v57, %v1201_v56  ;;  %vm1208_vm0 = vweird.f32 %v1463_v57 }
0x10de   :  { %vm1209_vm9 = vmor %vm1207_vm8, %vm1208_vm0 }
0x10df   :  { %v1204_v7 = vsub.f32 1.0, %v1203_v58 }
0x10e1   :  { %v1205_v5 = vmul.f32 %v1463_v57, %v1204_v7 }
0x10e3   :  { %v1206_v6 = vadd.f32 %v1463_v57, %v1205_v5 }
0x10e5   :  { %v1210_v9 = vsel %vm1209_vm9, %v1463_v57, %v1206_v6 }
0x10e6   :  { %v1215_v12 = vsel %vm1212_vm1, %v1214_v8, %v1210_v9 }
0x10e7   :  { %v1237_v17 = vmul.f32 %v1215_v12, %v1197_v53  ;;  %v1244_v1 = vmul.f32 %v1215_v12, %v1933_v14 }
0x10e9   :  { %1239 = vrot.lane.b32.xlu0 %v1237_v17, %s1582_s0 }
0x10f1   :  { %1272 = vrot.lane.b32.xlu0 %v1152_v48, %s1582_s0 }
0x112c   :  { %v1247_v18 = vpop.permute.xlu2 %1246 }
0x112d   :  { %v1249_v19 = vmul.f32 %v1247_v18, %v1215_v12 }
0x112f   :  { %1251 = vrot.lane.b32.xlu1 %v1249_v19, %s1583_s3 }
0x115b   :  { %v1240_v3 = vpop.permute.xlu0 %1239 }
0x115c   :  { %v1242_v20 = vadd.f32 %v1240_v3, %v1197_v53 }
0x115e   :  { %1464 = vtanh.f32 %v1242_v20 }
0x115f   :  { %1466 = vpow2.f32 %v1347_v21 }
0x1163   :  { %v1273_v28 = vpop.permute.xlu0 %1272 }
0x1164   :  { %v1465_v4 = vpop.eup %1464 }
0x1165   :  { %1268 = vrot.lane.b32.xlu2 %v1465_v4, %s1584_s8  ;;  %v1467_v22 = vpop.eup %1466 }
0x1166   :  { %v1220_v60 = vadd.f32 1.0, %v1467_v22 }
0x1168   :  { %1468 = vrcp.f32 %v1220_v60  ;;  %v1232_v15 = vand.u32 2147483648, %v1220_v60  ;;  %vm1226_vm13 = vweird.f32 %v1220_v60  ;;  %v1230_v16 = vand.u32 2147483647, %v1220_v60 }
0x116a   :  { %v1233_v27 = vor.u32 1.1754944e-38, %v1232_v15  ;;  %vm1231_vm15 = vcmp.eq.f32.partialorder %v1230_v16, 8.507059e+37 }
0x116e   :  { %v1469_v62 = vpop.eup %1468 }
0x116f   :  { %v1222_v63 = vmul.f32 %v1469_v62, %v1220_v60  ;;  %vm1227_vm12 = vweird.f32 %v1469_v62 }
0x1170   :  { %vm1228_vm14 = vmor %vm1226_vm13, %vm1227_vm12 }
0x1171   :  { %v1223_v10 = vsub.f32 1.0, %v1222_v63 }
0x1173   :  { %v1224_v11 = vmul.f32 %v1469_v62, %v1223_v10 }
0x1175   :  { %v1225_v13 = vadd.f32 %v1469_v62, %v1224_v11 }
0x1177   :  { %v1229_v26 = vsel %vm1228_vm14, %v1469_v62, %v1225_v13 }
0x1178   :  { %v1234_v14 = vsel %vm1231_vm15, %v1233_v27, %v1229_v26 }
0x1179   :  { %v1266_v30 = vsub.f32 1.0, %v1234_v14  ;;  %v1275_v32 = vmul.f32 %v1273_v28, %v1234_v14 }
0x11a1   :  { %v1252_v61 = vpop.permute.xlu1 %1251 }
0x11a2   :  { %v1254_v2 = vadd.f32 %v1252_v61, %v1244_v1 }
0x11a4   :  { %1470 = vtanh.f32 %v1254_v2 }
0x11aa   :  { %v1471_v0 = vpop.eup %1470 }
0x11ab   :  { %1257 = vrot.lane.b32.xlu1 %v1471_v0, %s1583_s3 }
0x11bf   :  { %v1269_v31 = vpop.permute.xlu2 %1268 }
0x11c0   :  { %v1271_v33 = vmul.f32 %v1269_v31, %v1266_v30 }
0x11c2   :  { %v1276_v34 = vadd.f32 %v1275_v32, %v1271_v33 }
0x11c4   :  { %1278 = vrot.lane.b32.xlu0 %v1276_v34, %s1583_s3 }
0x121d   :  { %v1258_v59 = vpop.permute.xlu1 %1257 }
0x121e   :  { %v1260_v35 = vmul.f32 %v1258_v59, %v1215_v12 }
0x1220   :  { %1262 = vrot.lane.b32.xlu2 %v1260_v35, %s1584_s8 }
0x1236   :  { %v1279_v38 = vpop.permute.xlu0 %1278 }
0x127a   :  { %v1263_v37 = vpop.permute.xlu2 %1262 }
0x127b   :  { %1265 = vst.msk [vmem:[#allocation9] sm:$0xff] %vm339_vm10, %v1263_v37 }
0x127c   :  { %1281 = vst.msk [vmem:[#allocation9] sm:$0xff] %vm356_vm11, %v1279_v38 }
0x127d   :  { %1292 = dma.vmem_to_hbm [thread:$0]  %s1288_s10, 128, %s1290_s13, [#allocation5]  }
0x127e   :  { %1572 = dma.done.wait [#allocation5], 128  }
0x127f   :  { %1573 = vsyncadd [#allocation5], 4294967168 }
0x1280   :  { %1297 = vsyncpa [#allocation4], 1 }
0x1281   :  { %1298 = vsyncpa [#allocation7], 1 }
0x1282   :  { %1299 = vsyncpa [#allocation5], 1 }

</bundles_post_ra>
